<compile_context>
chip_gen: v5e
topology: v5e:2x2
jax: 0.10.0
libtpu: 0.0.40
codegen_flags: <defaults>
</compile_context>

<pallas_src>
import functools
import math

import jax
import jax.numpy as jnp
from jax.experimental import pallas as pl
from jax.experimental.pallas import tpu as pltpu


# --------------------------------------------------------------------------
# Fused multi-layer FC-net Pallas kernel
# --------------------------------------------------------------------------
def _make_fcnet_kernel(n_layers: int, negative_slope: float = 0.2):
    """n_layers of (x @ W_i + b_i) with LeakyReLU(0.2) hidden activations and
    ReLU on the output layer (get_fc_net semantics).  The last layer's W/b and
    the output ref are N-tiles selected by the grid; everything else is the
    full (resident) array."""

    def kernel(x_ref, *refs):
        out_ref = refs[-1]
        wb = refs[:-1]  # [w0, b0, w1, b1, ...]
        h = x_ref[...]
        for i in range(n_layers):
            w = wb[2 * i][...]        # bf16
            b = wb[2 * i + 1][...]    # f32, shape (1, n_i) -> broadcasts
            h = jnp.dot(h.astype(w.dtype), w,
                        preferred_element_type=jnp.float32) + b
            if i < n_layers - 1:
                h = jnp.where(h > 0, h, negative_slope * h)   # nn.LeakyReLU(0.2)
            else:
                h = jnp.maximum(h, 0.0)                       # nn.ReLU()
        out_ref[...] = h.astype(out_ref.dtype)

    return kernel


def _pick_tile_n(out_dim: int, max_tile: int) -> int:
    """Largest multiple of 128 that divides out_dim and is <= max_tile; if the
    output dim is tiny / not lane-aligned, keep it whole (single tile)."""
    if out_dim % 128 != 0:
        return out_dim
    tn = min(max_tile, out_dim)
    tn -= tn % 128
    while out_dim % tn != 0:
        tn -= 128
    return tn


def _nbytes(shape, dtype) -> int:
    return math.prod(shape) * jnp.dtype(dtype).itemsize


def fc_net_apply(x, params, *, max_tile_n=512):
    """Apply a get_fc_net-style MLP. params: [(W, b)] with W:(in,out) bf16,
    b:(1,out) f32.  One fused pallas_call per net; last layer tiled over N."""
    n_layers = len(params)
    rows = x.shape[0]
    out_dim = params[-1][0].shape[1]
    tn = _pick_tile_n(out_dim, max_tile_n)
    grid = (out_dim // tn,)

    in_specs = [pl.BlockSpec(x.shape, lambda j: (0, 0))]
    block_bytes = _nbytes(x.shape, x.dtype)
    flat = []
    for li, (w, b) in enumerate(params):
        flat.extend([w, b])
        if li < n_layers - 1:
            # Resident hidden-layer weights: constant block index => DMA'd once.
            in_specs.append(pl.BlockSpec(w.shape, lambda j: (0, 0)))
            in_specs.append(pl.BlockSpec(b.shape, lambda j: (0, 0)))
            block_bytes += _nbytes(w.shape, w.dtype) + _nbytes(b.shape, b.dtype)
        else:
            # Last (widest) layer: stream N-tiles of W / b, double-buffered.
            in_specs.append(pl.BlockSpec((w.shape[0], tn), lambda j: (0, j)))
            in_specs.append(pl.BlockSpec((1, tn), lambda j: (0, j)))
            block_bytes += _nbytes((w.shape[0], tn), w.dtype)
            block_bytes += _nbytes((1, tn), b.dtype)

    out_specs = pl.BlockSpec((rows, tn), lambda j: (0, j))
    block_bytes += _nbytes((rows, tn), jnp.float32)

    # Budget: 2x (double buffering) for every block + compiler headroom,
    # clamped so it also fits v7x's 64 MiB VMEM per TensorCore.
    vmem_limit = int(min(48 * 1024 * 1024,
                         max(32 * 1024 * 1024, 2 * block_bytes + (8 << 20))))

    return pl.pallas_call(
        _make_fcnet_kernel(n_layers),
        out_shape=jax.ShapeDtypeStruct((rows, out_dim), jnp.float32),
        grid=grid,
        in_specs=in_specs,
        out_specs=out_specs,
        compiler_params=pltpu.CompilerParams(
            dimension_semantics=("parallel",),   # v7x: shard N-tiles over 2 TCs
            vmem_limit_bytes=vmem_limit,
        ),
    )(x, *flat)


# --------------------------------------------------------------------------
# Parameter construction (deterministic, PyTorch-Linear-like uniform init)
# --------------------------------------------------------------------------
def _init_fc_net(key, in_dim, hidden_dims, out_dim):
    dims = [in_dim, *hidden_dims, out_dim]
    params = []
    for i in range(len(dims) - 1):
        key, kw, kb = jax.random.split(key, 3)
        bound = 1.0 / (dims[i] ** 0.5)
        w = jax.random.uniform(kw, (dims[i], dims[i + 1]), jnp.float32, -bound, bound)
        b = jax.random.uniform(kb, (1, dims[i + 1]), jnp.float32, -bound, bound)
        # Weights stream from HBM every forward -> bf16 halves the bytes
        # (mem-bound kernel); biases are negligible bytes, keep f32.
        params.append((w.astype(jnp.bfloat16), b))
    return params


def init_gen_params(key, *, in_features, z_dim, noise_dim, nb_attributes,
                    ex_hidden, ea_hidden, da_hidden, dx_hidden):
    k_ex, k_ea, k_da, k_dx = jax.random.split(key, 4)
    return {
        "Ex": _init_fc_net(k_ex, in_features, ex_hidden, 2 * z_dim),
        "Ea": _init_fc_net(k_ea, nb_attributes + noise_dim, ea_hidden, 2 * z_dim),
        "Da": _init_fc_net(k_da, z_dim, da_hidden, nb_attributes),
        "Dx": _init_fc_net(k_dx, 2 * z_dim, dx_hidden, in_features),
    }


# --------------------------------------------------------------------------
# Gen.forward
# --------------------------------------------------------------------------
@functools.partial(jax.jit, static_argnames=("z_dim", "tile_n"))
def gen_forward(params, x, a, n, *, z_dim, tile_n=128):
    B = x.shape[0]

    # encode_x / encode_a
    zx = fc_net_apply(x, params["Ex"], max_tile_n=tile_n)                       # (B, 2z)
    za = fc_net_apply(jnp.concatenate([a, n], axis=1), params["Ea"],
                      max_tile_n=tile_n)                                        # (B, 2z)

    # Row-stack both paths so Dx / Da weights stream from HBM exactly once per
    # forward (previously Dx read 2x, Da 4x).
    z_all = jnp.concatenate([zx, za], axis=0)                                   # (2B, 2z)

    # decode_x for both paths in one call.  Note zx == [zx_attr | zx_cntx], so
    # no re-concat of the slices is needed.
    x1 = fc_net_apply(z_all, params["Dx"], max_tile_n=tile_n)                   # (2B, F)
    x1_x, x1_a = x1[:B], x1[B:]

    # decode_a / decode_gr_a for both paths in one call:
    # (2B, 2z) -> (4B, z) puts attr / cntx of each row in consecutive rows.
    # GradientReversal is identity in forward, so decode_gr_a shares Da weights.
    da_out = fc_net_apply(z_all.reshape(4 * B, z_dim), params["Da"],
                          max_tile_n=tile_n)                                    # (4B, A)
    da_out = da_out.reshape(2 * B, 2, -1)
    a1_x, a1_gr_x = da_out[:B, 0], da_out[:B, 1]
    a1_a, a1_gr_a = da_out[B:, 0], da_out[B:, 1]

    return (x1_x, a1_x, a1_gr_x), (x1_a, a1_a, a1_gr_a)


# --------------------------------------------------------------------------
# Pure-JAX reference (same bf16 weights / f32 accumulation) for validation
# --------------------------------------------------------------------------
def _fc_ref(x, params, slope=0.2):
    h = x
    for i, (w, b) in enumerate(params):
        h = jnp.dot(h.astype(w.dtype), w, preferred_element_type=jnp.float32) + b
        if i < len(params) - 1:
            h = jnp.where(h > 0, h, slope * h)
        else:
            h = jnp.maximum(h, 0.0)
    return h


def _gen_ref(params, x, a, n, z_dim):
    zx = _fc_ref(x, params["Ex"])
    zx_attr, zx_cntx = zx[:, :z_dim], zx[:, z_dim:]
    a1_x = _fc_ref(zx_attr, params["Da"])
    a1_gr_x = _fc_ref(zx_cntx, params["Da"])
    x1_x = _fc_ref(jnp.concatenate([zx_attr, zx_cntx], axis=1), params["Dx"])
    za = _fc_ref(jnp.concatenate([a, n], axis=1), params["Ea"])
    za_attr, za_cntx = za[:, :z_dim], za[:, z_dim:]
    a1_a = _fc_ref(za_attr, params["Da"])
    a1_gr_a = _fc_ref(za_cntx, params["Da"])
    x1_a = _fc_ref(jnp.concatenate([za_attr, za_cntx], axis=1), params["Dx"])
    return (x1_x, a1_x, a1_gr_x), (x1_a, a1_a, a1_gr_a)


# --------------------------------------------------------------------------
# Demo
# --------------------------------------------------------------------------
if __name__ == "__main__":
    # Scaled-down config (original: in_features=2048, z_dim=256, noise_dim=128,
    # hiddens Ex=(2048,1024), Ea=(1024,512), Da=(256,), Dx=(1024,2048)).
    batch = 4
    in_features = 256
    z_dim = 64
    noise_dim = 32
    nb_attributes = 16
    cfg = dict(
        in_features=in_features,
        z_dim=z_dim,
        noise_dim=noise_dim,
        nb_attributes=nb_attributes,
        ex_hidden=(256, 128),
        ea_hidden=(128, 64),
        da_hidden=(64,),
        dx_hidden=(128, 256),
    )

    root = jax.random.PRNGKey(0)
    k_params, kx, ka, kn = jax.random.split(root, 4)
    params = init_gen_params(k_params, **cfg)

    x = jax.random.normal(kx, (batch, in_features), jnp.float32)
    a = jax.random.normal(ka, (batch, nb_attributes), jnp.float32)
    n = jax.random.normal(kn, (batch, noise_dim), jnp.float32)

    (x1_x, a1_x, a1_gr_x), (x1_a, a1_a, a1_gr_a) = gen_forward(
        params, x, a, n, z_dim=z_dim, tile_n=128
    )
    outs = (x1_x, a1_x, a1_gr_x, x1_a, a1_a, a1_gr_a)
    jax.block_until_ready(outs)

    # shape sanity checks (forward contract of the PyTorch module)
    assert x1_x.shape == (batch, in_features)
    assert a1_x.shape == (batch, nb_attributes)
    assert a1_gr_x.shape == (batch, nb_attributes)
    assert x1_a.shape == (batch, in_features)
    assert a1_a.shape == (batch, nb_attributes)
    assert a1_gr_a.shape == (batch, nb_attributes)

    # numerical check against the (call-by-call) pure-JAX reference
    (rx1_x, ra1_x, ra1_gr_x), (rx1_a, ra1_a, ra1_gr_a) = _gen_ref(
        params, x, a, n, z_dim)
    refs = (rx1_x, ra1_x, ra1_gr_x, rx1_a, ra1_a, ra1_gr_a)
    for got, ref in zip(outs, refs):
        assert bool(jnp.allclose(got, ref, rtol=2e-2, atol=2e-2)), "mismatch vs reference"

    print("KERNEL_OK")
</pallas_src>

<mosaic_0001>
module attributes {stable_mosaic.version = 11 : i64} {
  func.func @kernel(%arg0: i32, %arg1: memref<4x256xf32, #tpu.memory_space<vmem>>, %arg2: memref<256x256xbf16, #tpu.memory_space<vmem>>, %arg3: memref<1x256xf32, #tpu.memory_space<vmem>>, %arg4: memref<256x128xbf16, #tpu.memory_space<vmem>>, %arg5: memref<1x128xf32, #tpu.memory_space<vmem>>, %arg6: memref<128x128xbf16, #tpu.memory_space<vmem>>, %arg7: memref<1x128xf32, #tpu.memory_space<vmem>>, %arg8: memref<4x128xf32, #tpu.memory_space<vmem>>) attributes {dimension_semantics = [#tpu.dimension_semantics<parallel>], iteration_bounds = array<i64: 1>, scalar_prefetch = 0 : i64, scratch_operands = 0 : i64, tpu.core_type = #tpu.core_type<tc>, window_params = [{pipeline_mode = #tpu.pipeline_mode<synchronous>, transform_indices = @transform_0, window_bounds = array<i64: 4, 256>}, {pipeline_mode = #tpu.pipeline_mode<synchronous>, transform_indices = @transform_1, window_bounds = array<i64: 256, 256>}, {pipeline_mode = #tpu.pipeline_mode<synchronous>, transform_indices = @transform_2, window_bounds = array<i64: 1, 256>}, {pipeline_mode = #tpu.pipeline_mode<synchronous>, transform_indices = @transform_3, window_bounds = array<i64: 256, 128>}, {pipeline_mode = #tpu.pipeline_mode<synchronous>, transform_indices = @transform_4, window_bounds = array<i64: 1, 128>}, {transform_indices = @transform_5, window_bounds = array<i64: 128, 128>}, {transform_indices = @transform_6, window_bounds = array<i64: 1, 128>}, {transform_indices = @transform_7, window_bounds = array<i64: 4, 128>}]} {
    %c0 = arith.constant 0 : index
    %c0_0 = arith.constant 0 : index
    %0 = vector.load %arg1[%c0, %c0_0] : memref<4x256xf32, #tpu.memory_space<vmem>>, vector<4x256xf32>
    %c0_1 = arith.constant 0 : index
    %c0_2 = arith.constant 0 : index
    %1 = vector.load %arg2[%c0_1, %c0_2] : memref<256x256xbf16, #tpu.memory_space<vmem>>, vector<256x256xbf16>
    %c0_3 = arith.constant 0 : index
    %c0_4 = arith.constant 0 : index
    %2 = vector.load %arg3[%c0_3, %c0_4] : memref<1x256xf32, #tpu.memory_space<vmem>>, vector<1x256xf32>
    %3 = arith.truncf %0 : vector<4x256xf32> to vector<4x256xbf16>
    %cst = arith.constant dense<0.000000e+00> : vector<4x256xf32>
    %4 = tpu.matmul %3, %1, %cst {dimension_numbers = #tpu.dot_dimension_numbers<[1], [0], [0], [1], [0, 0, 1, 1], [], []>} : vector<4x256xbf16>, vector<256x256xbf16>, vector<4x256xf32> -> vector<4x256xf32>
    %5 = vector.broadcast %2 : vector<1x256xf32> to vector<4x256xf32>
    %6 = arith.addf %4, %5 : vector<4x256xf32>
    %cst_5 = arith.constant 0.000000e+00 : f32
    %7 = vector.broadcast %cst_5 : f32 to vector<4x256xf32>
    %8 = arith.cmpf ogt, %6, %7 : vector<4x256xf32>
    %cst_6 = arith.constant 2.000000e-01 : f32
    %9 = vector.broadcast %cst_6 : f32 to vector<4x256xf32>
    %10 = arith.mulf %9, %6 : vector<4x256xf32>
    %11 = arith.select %8, %6, %10 : vector<4x256xi1>, vector<4x256xf32>
    %c0_7 = arith.constant 0 : index
    %c0_8 = arith.constant 0 : index
    %12 = vector.load %arg4[%c0_7, %c0_8] : memref<256x128xbf16, #tpu.memory_space<vmem>>, vector<256x128xbf16>
    %c0_9 = arith.constant 0 : index
    %c0_10 = arith.constant 0 : index
    %13 = vector.load %arg5[%c0_9, %c0_10] : memref<1x128xf32, #tpu.memory_space<vmem>>, vector<1x128xf32>
    %14 = arith.truncf %11 : vector<4x256xf32> to vector<4x256xbf16>
    %cst_11 = arith.constant dense<0.000000e+00> : vector<4x128xf32>
    %15 = tpu.matmul %14, %12, %cst_11 {dimension_numbers = #tpu.dot_dimension_numbers<[1], [0], [0], [1], [0, 0, 1, 1], [], []>} : vector<4x256xbf16>, vector<256x128xbf16>, vector<4x128xf32> -> vector<4x128xf32>
    %16 = vector.broadcast %13 : vector<1x128xf32> to vector<4x128xf32>
    %17 = arith.addf %15, %16 : vector<4x128xf32>
    %cst_12 = arith.constant 0.000000e+00 : f32
    %18 = vector.broadcast %cst_12 : f32 to vector<4x128xf32>
    %19 = arith.cmpf ogt, %17, %18 : vector<4x128xf32>
    %cst_13 = arith.constant 2.000000e-01 : f32
    %20 = vector.broadcast %cst_13 : f32 to vector<4x128xf32>
    %21 = arith.mulf %20, %17 : vector<4x128xf32>
    %22 = arith.select %19, %17, %21 : vector<4x128xi1>, vector<4x128xf32>
    %c0_14 = arith.constant 0 : index
    %c0_15 = arith.constant 0 : index
    %23 = vector.load %arg6[%c0_14, %c0_15] : memref<128x128xbf16, #tpu.memory_space<vmem>>, vector<128x128xbf16>
    %c0_16 = arith.constant 0 : index
    %c0_17 = arith.constant 0 : index
    %24 = vector.load %arg7[%c0_16, %c0_17] : memref<1x128xf32, #tpu.memory_space<vmem>>, vector<1x128xf32>
    %25 = arith.truncf %22 : vector<4x128xf32> to vector<4x128xbf16>
    %cst_18 = arith.constant dense<0.000000e+00> : vector<4x128xf32>
    %26 = tpu.matmul %25, %23, %cst_18 {dimension_numbers = #tpu.dot_dimension_numbers<[1], [0], [0], [1], [0, 0, 1, 1], [], []>} : vector<4x128xbf16>, vector<128x128xbf16>, vector<4x128xf32> -> vector<4x128xf32>
    %27 = vector.broadcast %24 : vector<1x128xf32> to vector<4x128xf32>
    %28 = arith.addf %26, %27 : vector<4x128xf32>
    %cst_19 = arith.constant 0.000000e+00 : f32
    %29 = vector.broadcast %cst_19 : f32 to vector<4x128xf32>
    %30 = arith.maximumf %28, %29 : vector<4x128xf32>
    %c0_20 = arith.constant 0 : index
    %c0_21 = arith.constant 0 : index
    %31 = vector.load %arg8[%c0_20, %c0_21] : memref<4x128xf32, #tpu.memory_space<vmem>>, vector<4x128xf32>
    tpu.vector_store %arg8[%c0_20, %c0_21], %30 {strides = array<i32>} : memref<4x128xf32, #tpu.memory_space<vmem>>, vector<4x128xf32>,
    return
  }
  func.func @transform_0(%arg0: i32) -> (i32, i32) {
    %c0_i32 = arith.constant 0 : i32
    %c0_i32_0 = arith.constant 0 : i32
    %c0_i32_1 = arith.constant 0 : i32
    return %c0_i32, %c0_i32_0 : i32, i32
  }
  func.func @transform_1(%arg0: i32) -> (i32, i32) {
    %c0_i32 = arith.constant 0 : i32
    %c0_i32_0 = arith.constant 0 : i32
    %c0_i32_1 = arith.constant 0 : i32
    return %c0_i32, %c0_i32_0 : i32, i32
  }
  func.func @transform_2(%arg0: i32) -> (i32, i32) {
    %c0_i32 = arith.constant 0 : i32
    %c0_i32_0 = arith.constant 0 : i32
    %c0_i32_1 = arith.constant 0 : i32
    return %c0_i32, %c0_i32_0 : i32, i32
  }
  func.func @transform_3(%arg0: i32) -> (i32, i32) {
    %c0_i32 = arith.constant 0 : i32
    %c0_i32_0 = arith.constant 0 : i32
    %c0_i32_1 = arith.constant 0 : i32
    return %c0_i32, %c0_i32_0 : i32, i32
  }
  func.func @transform_4(%arg0: i32) -> (i32, i32) {
    %c0_i32 = arith.constant 0 : i32
    %c0_i32_0 = arith.constant 0 : i32
    %c0_i32_1 = arith.constant 0 : i32
    return %c0_i32, %c0_i32_0 : i32, i32
  }
  func.func @transform_5(%arg0: i32) -> (i32, i32) {
    %c0_i32 = arith.constant 0 : i32
    %c0_i32_0 = arith.constant 0 : i32
    return %c0_i32, %arg0 : i32, i32
  }
  func.func @transform_6(%arg0: i32) -> (i32, i32) {
    %c0_i32 = arith.constant 0 : i32
    %c0_i32_0 = arith.constant 0 : i32
    return %c0_i32, %arg0 : i32, i32
  }
  func.func @transform_7(%arg0: i32) -> (i32, i32) {
    %c0_i32 = arith.constant 0 : i32
    %c0_i32_0 = arith.constant 0 : i32
    return %c0_i32, %arg0 : i32, i32
  }
}

module attributes {stable_mosaic.version = 11 : i64} {
  func.func @kernel(%arg0: i32, %arg1: memref<4x48xf32, #tpu.memory_space<vmem>>, %arg2: memref<48x128xbf16, #tpu.memory_space<vmem>>, %arg3: memref<1x128xf32, #tpu.memory_space<vmem>>, %arg4: memref<128x64xbf16, #tpu.memory_space<vmem>>, %arg5: memref<1x64xf32, #tpu.memory_space<vmem>>, %arg6: memref<64x128xbf16, #tpu.memory_space<vmem>>, %arg7: memref<1x128xf32, #tpu.memory_space<vmem>>, %arg8: memref<4x128xf32, #tpu.memory_space<vmem>>) attributes {dimension_semantics = [#tpu.dimension_semantics<parallel>], iteration_bounds = array<i64: 1>, scalar_prefetch = 0 : i64, scratch_operands = 0 : i64, tpu.core_type = #tpu.core_type<tc>, window_params = [{pipeline_mode = #tpu.pipeline_mode<synchronous>, transform_indices = @transform_0, window_bounds = array<i64: 4, 48>}, {pipeline_mode = #tpu.pipeline_mode<synchronous>, transform_indices = @transform_1, window_bounds = array<i64: 48, 128>}, {pipeline_mode = #tpu.pipeline_mode<synchronous>, transform_indices = @transform_2, window_bounds = array<i64: 1, 128>}, {pipeline_mode = #tpu.pipeline_mode<synchronous>, transform_indices = @transform_3, window_bounds = array<i64: 128, 64>}, {pipeline_mode = #tpu.pipeline_mode<synchronous>, transform_indices = @transform_4, window_bounds = array<i64: 1, 64>}, {transform_indices = @transform_5, window_bounds = array<i64: 64, 128>}, {transform_indices = @transform_6, window_bounds = array<i64: 1, 128>}, {transform_indices = @transform_7, window_bounds = array<i64: 4, 128>}]} {
    %c0 = arith.constant 0 : index
    %c0_0 = arith.constant 0 : index
    %0 = vector.load %arg1[%c0, %c0_0] : memref<4x48xf32, #tpu.memory_space<vmem>>, vector<4x48xf32>
    %c0_1 = arith.constant 0 : index
    %c0_2 = arith.constant 0 : index
    %1 = vector.load %arg2[%c0_1, %c0_2] : memref<48x128xbf16, #tpu.memory_space<vmem>>, vector<48x128xbf16>
    %c0_3 = arith.constant 0 : index
    %c0_4 = arith.constant 0 : index
    %2 = vector.load %arg3[%c0_3, %c0_4] : memref<1x128xf32, #tpu.memory_space<vmem>>, vector<1x128xf32>
    %3 = arith.truncf %0 : vector<4x48xf32> to vector<4x48xbf16>
    %cst = arith.constant dense<0.000000e+00> : vector<4x128xf32>
    %4 = tpu.matmul %3, %1, %cst {dimension_numbers = #tpu.dot_dimension_numbers<[1], [0], [0], [1], [0, 0, 1, 1], [], []>} : vector<4x48xbf16>, vector<48x128xbf16>, vector<4x128xf32> -> vector<4x128xf32>
    %5 = vector.broadcast %2 : vector<1x128xf32> to vector<4x128xf32>
    %6 = arith.addf %4, %5 : vector<4x128xf32>
    %cst_5 = arith.constant 0.000000e+00 : f32
    %7 = vector.broadcast %cst_5 : f32 to vector<4x128xf32>
    %8 = arith.cmpf ogt, %6, %7 : vector<4x128xf32>
    %cst_6 = arith.constant 2.000000e-01 : f32
    %9 = vector.broadcast %cst_6 : f32 to vector<4x128xf32>
    %10 = arith.mulf %9, %6 : vector<4x128xf32>
    %11 = arith.select %8, %6, %10 : vector<4x128xi1>, vector<4x128xf32>
    %c0_7 = arith.constant 0 : index
    %c0_8 = arith.constant 0 : index
    %12 = vector.load %arg4[%c0_7, %c0_8] : memref<128x64xbf16, #tpu.memory_space<vmem>>, vector<128x64xbf16>
    %c0_9 = arith.constant 0 : index
    %c0_10 = arith.constant 0 : index
    %13 = vector.load %arg5[%c0_9, %c0_10] : memref<1x64xf32, #tpu.memory_space<vmem>>, vector<1x64xf32>
    %14 = arith.truncf %11 : vector<4x128xf32> to vector<4x128xbf16>
    %cst_11 = arith.constant dense<0.000000e+00> : vector<4x64xf32>
    %15 = tpu.matmul %14, %12, %cst_11 {dimension_numbers = #tpu.dot_dimension_numbers<[1], [0], [0], [1], [0, 0, 1, 1], [], []>} : vector<4x128xbf16>, vector<128x64xbf16>, vector<4x64xf32> -> vector<4x64xf32>
    %16 = vector.broadcast %13 : vector<1x64xf32> to vector<4x64xf32>
    %17 = arith.addf %15, %16 : vector<4x64xf32>
    %cst_12 = arith.constant 0.000000e+00 : f32
    %18 = vector.broadcast %cst_12 : f32 to vector<4x64xf32>
    %19 = arith.cmpf ogt, %17, %18 : vector<4x64xf32>
    %cst_13 = arith.constant 2.000000e-01 : f32
    %20 = vector.broadcast %cst_13 : f32 to vector<4x64xf32>
    %21 = arith.mulf %20, %17 : vector<4x64xf32>
    %22 = arith.select %19, %17, %21 : vector<4x64xi1>, vector<4x64xf32>
    %c0_14 = arith.constant 0 : index
    %c0_15 = arith.constant 0 : index
    %23 = vector.load %arg6[%c0_14, %c0_15] : memref<64x128xbf16, #tpu.memory_space<vmem>>, vector<64x128xbf16>
    %c0_16 = arith.constant 0 : index
    %c0_17 = arith.constant 0 : index
    %24 = vector.load %arg7[%c0_16, %c0_17] : memref<1x128xf32, #tpu.memory_space<vmem>>, vector<1x128xf32>
    %25 = arith.truncf %22 : vector<4x64xf32> to vector<4x64xbf16>
    %cst_18 = arith.constant dense<0.000000e+00> : vector<4x128xf32>
    %26 = tpu.matmul %25, %23, %cst_18 {dimension_numbers = #tpu.dot_dimension_numbers<[1], [0], [0], [1], [0, 0, 1, 1], [], []>} : vector<4x64xbf16>, vector<64x128xbf16>, vector<4x128xf32> -> vector<4x128xf32>
    %27 = vector.broadcast %24 : vector<1x128xf32> to vector<4x128xf32>
    %28 = arith.addf %26, %27 : vector<4x128xf32>
    %cst_19 = arith.constant 0.000000e+00 : f32
    %29 = vector.broadcast %cst_19 : f32 to vector<4x128xf32>
    %30 = arith.maximumf %28, %29 : vector<4x128xf32>
    %c0_20 = arith.constant 0 : index
    %c0_21 = arith.constant 0 : index
    %31 = vector.load %arg8[%c0_20, %c0_21] : memref<4x128xf32, #tpu.memory_space<vmem>>, vector<4x128xf32>
    tpu.vector_store %arg8[%c0_20, %c0_21], %30 {strides = array<i32>} : memref<4x128xf32, #tpu.memory_space<vmem>>, vector<4x128xf32>,
    return
  }
  func.func @transform_0(%arg0: i32) -> (i32, i32) {
    %c0_i32 = arith.constant 0 : i32
    %c0_i32_0 = arith.constant 0 : i32
    %c0_i32_1 = arith.constant 0 : i32
    return %c0_i32, %c0_i32_0 : i32, i32
  }
  func.func @transform_1(%arg0: i32) -> (i32, i32) {
    %c0_i32 = arith.constant 0 : i32
    %c0_i32_0 = arith.constant 0 : i32
    %c0_i32_1 = arith.constant 0 : i32
    return %c0_i32, %c0_i32_0 : i32, i32
  }
  func.func @transform_2(%arg0: i32) -> (i32, i32) {
    %c0_i32 = arith.constant 0 : i32
    %c0_i32_0 = arith.constant 0 : i32
    %c0_i32_1 = arith.constant 0 : i32
    return %c0_i32, %c0_i32_0 : i32, i32
  }
  func.func @transform_3(%arg0: i32) -> (i32, i32) {
    %c0_i32 = arith.constant 0 : i32
    %c0_i32_0 = arith.constant 0 : i32
    %c0_i32_1 = arith.constant 0 : i32
    return %c0_i32, %c0_i32_0 : i32, i32
  }
  func.func @transform_4(%arg0: i32) -> (i32, i32) {
    %c0_i32 = arith.constant 0 : i32
    %c0_i32_0 = arith.constant 0 : i32
    %c0_i32_1 = arith.constant 0 : i32
    return %c0_i32, %c0_i32_0 : i32, i32
  }
  func.func @transform_5(%arg0: i32) -> (i32, i32) {
    %c0_i32 = arith.constant 0 : i32
    %c0_i32_0 = arith.constant 0 : i32
    return %c0_i32, %arg0 : i32, i32
  }
  func.func @transform_6(%arg0: i32) -> (i32, i32) {
    %c0_i32 = arith.constant 0 : i32
    %c0_i32_0 = arith.constant 0 : i32
    return %c0_i32, %arg0 : i32, i32
  }
  func.func @transform_7(%arg0: i32) -> (i32, i32) {
    %c0_i32 = arith.constant 0 : i32
    %c0_i32_0 = arith.constant 0 : i32
    return %c0_i32, %arg0 : i32, i32
  }
}

module attributes {stable_mosaic.version = 11 : i64} {
  func.func @kernel(%arg0: i32, %arg1: memref<8x128xf32, #tpu.memory_space<vmem>>, %arg2: memref<128x128xbf16, #tpu.memory_space<vmem>>, %arg3: memref<1x128xf32, #tpu.memory_space<vmem>>, %arg4: memref<128x256xbf16, #tpu.memory_space<vmem>>, %arg5: memref<1x256xf32, #tpu.memory_space<vmem>>, %arg6: memref<256x128xbf16, #tpu.memory_space<vmem>>, %arg7: memref<1x128xf32, #tpu.memory_space<vmem>>, %arg8: memref<8x128xf32, #tpu.memory_space<vmem>>) attributes {dimension_semantics = [#tpu.dimension_semantics<parallel>], iteration_bounds = array<i64: 2>, scalar_prefetch = 0 : i64, scratch_operands = 0 : i64, tpu.core_type = #tpu.core_type<tc>, window_params = [{pipeline_mode = #tpu.pipeline_mode<synchronous>, transform_indices = @transform_0, window_bounds = array<i64: 8, 128>}, {pipeline_mode = #tpu.pipeline_mode<synchronous>, transform_indices = @transform_1, window_bounds = array<i64: 128, 128>}, {pipeline_mode = #tpu.pipeline_mode<synchronous>, transform_indices = @transform_2, window_bounds = array<i64: 1, 128>}, {pipeline_mode = #tpu.pipeline_mode<synchronous>, transform_indices = @transform_3, window_bounds = array<i64: 128, 256>}, {pipeline_mode = #tpu.pipeline_mode<synchronous>, transform_indices = @transform_4, window_bounds = array<i64: 1, 256>}, {transform_indices = @transform_5, window_bounds = array<i64: 256, 128>}, {transform_indices = @transform_6, window_bounds = array<i64: 1, 128>}, {transform_indices = @transform_7, window_bounds = array<i64: 8, 128>}]} {
    %c0 = arith.constant 0 : index
    %c0_0 = arith.constant 0 : index
    %0 = vector.load %arg1[%c0, %c0_0] : memref<8x128xf32, #tpu.memory_space<vmem>>, vector<8x128xf32>
    %c0_1 = arith.constant 0 : index
    %c0_2 = arith.constant 0 : index
    %1 = vector.load %arg2[%c0_1, %c0_2] : memref<128x128xbf16, #tpu.memory_space<vmem>>, vector<128x128xbf16>
    %c0_3 = arith.constant 0 : index
    %c0_4 = arith.constant 0 : index
    %2 = vector.load %arg3[%c0_3, %c0_4] : memref<1x128xf32, #tpu.memory_space<vmem>>, vector<1x128xf32>
    %3 = arith.truncf %0 : vector<8x128xf32> to vector<8x128xbf16>
    %cst = arith.constant dense<0.000000e+00> : vector<8x128xf32>
    %4 = tpu.matmul %3, %1, %cst {dimension_numbers = #tpu.dot_dimension_numbers<[1], [0], [0], [1], [0, 0, 1, 1], [], []>} : vector<8x128xbf16>, vector<128x128xbf16>, vector<8x128xf32> -> vector<8x128xf32>
    %5 = vector.broadcast %2 : vector<1x128xf32> to vector<8x128xf32>
    %6 = arith.addf %4, %5 : vector<8x128xf32>
    %cst_5 = arith.constant 0.000000e+00 : f32
    %7 = vector.broadcast %cst_5 : f32 to vector<8x128xf32>
    %8 = arith.cmpf ogt, %6, %7 : vector<8x128xf32>
    %cst_6 = arith.constant 2.000000e-01 : f32
    %9 = vector.broadcast %cst_6 : f32 to vector<8x128xf32>
    %10 = arith.mulf %9, %6 : vector<8x128xf32>
    %11 = arith.select %8, %6, %10 : vector<8x128xi1>, vector<8x128xf32>
    %c0_7 = arith.constant 0 : index
    %c0_8 = arith.constant 0 : index
    %12 = vector.load %arg4[%c0_7, %c0_8] : memref<128x256xbf16, #tpu.memory_space<vmem>>, vector<128x256xbf16>
    %c0_9 = arith.constant 0 : index
    %c0_10 = arith.constant 0 : index
    %13 = vector.load %arg5[%c0_9, %c0_10] : memref<1x256xf32, #tpu.memory_space<vmem>>, vector<1x256xf32>
    %14 = arith.truncf %11 : vector<8x128xf32> to vector<8x128xbf16>
    %cst_11 = arith.constant dense<0.000000e+00> : vector<8x256xf32>
    %15 = tpu.matmul %14, %12, %cst_11 {dimension_numbers = #tpu.dot_dimension_numbers<[1], [0], [0], [1], [0, 0, 1, 1], [], []>} : vector<8x128xbf16>, vector<128x256xbf16>, vector<8x256xf32> -> vector<8x256xf32>
    %16 = vector.broadcast %13 : vector<1x256xf32> to vector<8x256xf32>
    %17 = arith.addf %15, %16 : vector<8x256xf32>
    %cst_12 = arith.constant 0.000000e+00 : f32
    %18 = vector.broadcast %cst_12 : f32 to vector<8x256xf32>
    %19 = arith.cmpf ogt, %17, %18 : vector<8x256xf32>
    %cst_13 = arith.constant 2.000000e-01 : f32
    %20 = vector.broadcast %cst_13 : f32 to vector<8x256xf32>
    %21 = arith.mulf %20, %17 : vector<8x256xf32>
    %22 = arith.select %19, %17, %21 : vector<8x256xi1>, vector<8x256xf32>
    %c0_14 = arith.constant 0 : index
    %c0_15 = arith.constant 0 : index
    %23 = vector.load %arg6[%c0_14, %c0_15] : memref<256x128xbf16, #tpu.memory_space<vmem>>, vector<256x128xbf16>
    %c0_16 = arith.constant 0 : index
    %c0_17 = arith.constant 0 : index
    %24 = vector.load %arg7[%c0_16, %c0_17] : memref<1x128xf32, #tpu.memory_space<vmem>>, vector<1x128xf32>
    %25 = arith.truncf %22 : vector<8x256xf32> to vector<8x256xbf16>
    %cst_18 = arith.constant dense<0.000000e+00> : vector<8x128xf32>
    %26 = tpu.matmul %25, %23, %cst_18 {dimension_numbers = #tpu.dot_dimension_numbers<[1], [0], [0], [1], [0, 0, 1, 1], [], []>} : vector<8x256xbf16>, vector<256x128xbf16>, vector<8x128xf32> -> vector<8x128xf32>
    %27 = vector.broadcast %24 : vector<1x128xf32> to vector<8x128xf32>
    %28 = arith.addf %26, %27 : vector<8x128xf32>
    %cst_19 = arith.constant 0.000000e+00 : f32
    %29 = vector.broadcast %cst_19 : f32 to vector<8x128xf32>
    %30 = arith.maximumf %28, %29 : vector<8x128xf32>
    %c0_20 = arith.constant 0 : index
    %c0_21 = arith.constant 0 : index
    %31 = vector.load %arg8[%c0_20, %c0_21] : memref<8x128xf32, #tpu.memory_space<vmem>>, vector<8x128xf32>
    tpu.vector_store %arg8[%c0_20, %c0_21], %30 {strides = array<i32>} : memref<8x128xf32, #tpu.memory_space<vmem>>, vector<8x128xf32>,
    return
  }
  func.func @transform_0(%arg0: i32) -> (i32, i32) {
    %c0_i32 = arith.constant 0 : i32
    %c0_i32_0 = arith.constant 0 : i32
    %c0_i32_1 = arith.constant 0 : i32
    return %c0_i32, %c0_i32_0 : i32, i32
  }
  func.func @transform_1(%arg0: i32) -> (i32, i32) {
    %c0_i32 = arith.constant 0 : i32
    %c0_i32_0 = arith.constant 0 : i32
    %c0_i32_1 = arith.constant 0 : i32
    return %c0_i32, %c0_i32_0 : i32, i32
  }
  func.func @transform_2(%arg0: i32) -> (i32, i32) {
    %c0_i32 = arith.constant 0 : i32
    %c0_i32_0 = arith.constant 0 : i32
    %c0_i32_1 = arith.constant 0 : i32
    return %c0_i32, %c0_i32_0 : i32, i32
  }
  func.func @transform_3(%arg0: i32) -> (i32, i32) {
    %c0_i32 = arith.constant 0 : i32
    %c0_i32_0 = arith.constant 0 : i32
    %c0_i32_1 = arith.constant 0 : i32
    return %c0_i32, %c0_i32_0 : i32, i32
  }
  func.func @transform_4(%arg0: i32) -> (i32, i32) {
    %c0_i32 = arith.constant 0 : i32
    %c0_i32_0 = arith.constant 0 : i32
    %c0_i32_1 = arith.constant 0 : i32
    return %c0_i32, %c0_i32_0 : i32, i32
  }
  func.func @transform_5(%arg0: i32) -> (i32, i32) {
    %c0_i32 = arith.constant 0 : i32
    %c0_i32_0 = arith.constant 0 : i32
    return %c0_i32, %arg0 : i32, i32
  }
  func.func @transform_6(%arg0: i32) -> (i32, i32) {
    %c0_i32 = arith.constant 0 : i32
    %c0_i32_0 = arith.constant 0 : i32
    return %c0_i32, %arg0 : i32, i32
  }
  func.func @transform_7(%arg0: i32) -> (i32, i32) {
    %c0_i32 = arith.constant 0 : i32
    %c0_i32_0 = arith.constant 0 : i32
    return %c0_i32, %arg0 : i32, i32
  }
}

module attributes {stable_mosaic.version = 11 : i64} {
  func.func @kernel(%arg0: i32, %arg1: memref<16x64xf32, #tpu.memory_space<vmem>>, %arg2: memref<64x64xbf16, #tpu.memory_space<vmem>>, %arg3: memref<1x64xf32, #tpu.memory_space<vmem>>, %arg4: memref<64x16xbf16, #tpu.memory_space<vmem>>, %arg5: memref<1x16xf32, #tpu.memory_space<vmem>>, %arg6: memref<16x16xf32, #tpu.memory_space<vmem>>) attributes {dimension_semantics = [#tpu.dimension_semantics<parallel>], iteration_bounds = array<i64: 1>, scalar_prefetch = 0 : i64, scratch_operands = 0 : i64, tpu.core_type = #tpu.core_type<tc>, window_params = [{pipeline_mode = #tpu.pipeline_mode<synchronous>, transform_indices = @transform_0, window_bounds = array<i64: 16, 64>}, {pipeline_mode = #tpu.pipeline_mode<synchronous>, transform_indices = @transform_1, window_bounds = array<i64: 64, 64>}, {pipeline_mode = #tpu.pipeline_mode<synchronous>, transform_indices = @transform_2, window_bounds = array<i64: 1, 64>}, {transform_indices = @transform_3, window_bounds = array<i64: 64, 16>}, {transform_indices = @transform_4, window_bounds = array<i64: 1, 16>}, {transform_indices = @transform_5, window_bounds = array<i64: 16, 16>}]} {
    %c0 = arith.constant 0 : index
    %c0_0 = arith.constant 0 : index
    %0 = vector.load %arg1[%c0, %c0_0] : memref<16x64xf32, #tpu.memory_space<vmem>>, vector<16x64xf32>
    %c0_1 = arith.constant 0 : index
    %c0_2 = arith.constant 0 : index
    %1 = vector.load %arg2[%c0_1, %c0_2] : memref<64x64xbf16, #tpu.memory_space<vmem>>, vector<64x64xbf16>
    %c0_3 = arith.constant 0 : index
    %c0_4 = arith.constant 0 : index
    %2 = vector.load %arg3[%c0_3, %c0_4] : memref<1x64xf32, #tpu.memory_space<vmem>>, vector<1x64xf32>
    %3 = arith.truncf %0 : vector<16x64xf32> to vector<16x64xbf16>
    %cst = arith.constant dense<0.000000e+00> : vector<16x64xf32>
    %4 = tpu.matmul %3, %1, %cst {dimension_numbers = #tpu.dot_dimension_numbers<[1], [0], [0], [1], [0, 0, 1, 1], [], []>} : vector<16x64xbf16>, vector<64x64xbf16>, vector<16x64xf32> -> vector<16x64xf32>
    %5 = vector.broadcast %2 : vector<1x64xf32> to vector<16x64xf32>
    %6 = arith.addf %4, %5 : vector<16x64xf32>
    %cst_5 = arith.constant 0.000000e+00 : f32
    %7 = vector.broadcast %cst_5 : f32 to vector<16x64xf32>
    %8 = arith.cmpf ogt, %6, %7 : vector<16x64xf32>
    %cst_6 = arith.constant 2.000000e-01 : f32
    %9 = vector.broadcast %cst_6 : f32 to vector<16x64xf32>
    %10 = arith.mulf %9, %6 : vector<16x64xf32>
    %11 = arith.select %8, %6, %10 : vector<16x64xi1>, vector<16x64xf32>
    %c0_7 = arith.constant 0 : index
    %c0_8 = arith.constant 0 : index
    %12 = vector.load %arg4[%c0_7, %c0_8] : memref<64x16xbf16, #tpu.memory_space<vmem>>, vector<64x16xbf16>
    %c0_9 = arith.constant 0 : index
    %c0_10 = arith.constant 0 : index
    %13 = vector.load %arg5[%c0_9, %c0_10] : memref<1x16xf32, #tpu.memory_space<vmem>>, vector<1x16xf32>
    %14 = arith.truncf %11 : vector<16x64xf32> to vector<16x64xbf16>
    %cst_11 = arith.constant dense<0.000000e+00> : vector<16x16xf32>
    %15 = tpu.matmul %14, %12, %cst_11 {dimension_numbers = #tpu.dot_dimension_numbers<[1], [0], [0], [1], [0, 0, 1, 1], [], []>} : vector<16x64xbf16>, vector<64x16xbf16>, vector<16x16xf32> -> vector<16x16xf32>
    %16 = vector.broadcast %13 : vector<1x16xf32> to vector<16x16xf32>
    %17 = arith.addf %15, %16 : vector<16x16xf32>
    %cst_12 = arith.constant 0.000000e+00 : f32
    %18 = vector.broadcast %cst_12 : f32 to vector<16x16xf32>
    %19 = arith.maximumf %17, %18 : vector<16x16xf32>
    %c0_13 = arith.constant 0 : index
    %c0_14 = arith.constant 0 : index
    %20 = vector.load %arg6[%c0_13, %c0_14] : memref<16x16xf32, #tpu.memory_space<vmem>>, vector<16x16xf32>
    tpu.vector_store %arg6[%c0_13, %c0_14], %19 {strides = array<i32>} : memref<16x16xf32, #tpu.memory_space<vmem>>, vector<16x16xf32>,
    return
  }
  func.func @transform_0(%arg0: i32) -> (i32, i32) {
    %c0_i32 = arith.constant 0 : i32
    %c0_i32_0 = arith.constant 0 : i32
    %c0_i32_1 = arith.constant 0 : i32
    return %c0_i32, %c0_i32_0 : i32, i32
  }
  func.func @transform_1(%arg0: i32) -> (i32, i32) {
    %c0_i32 = arith.constant 0 : i32
    %c0_i32_0 = arith.constant 0 : i32
    %c0_i32_1 = arith.constant 0 : i32
    return %c0_i32, %c0_i32_0 : i32, i32
  }
  func.func @transform_2(%arg0: i32) -> (i32, i32) {
    %c0_i32 = arith.constant 0 : i32
    %c0_i32_0 = arith.constant 0 : i32
    %c0_i32_1 = arith.constant 0 : i32
    return %c0_i32, %c0_i32_0 : i32, i32
  }
  func.func @transform_3(%arg0: i32) -> (i32, i32) {
    %c0_i32 = arith.constant 0 : i32
    %c0_i32_0 = arith.constant 0 : i32
    return %c0_i32, %arg0 : i32, i32
  }
  func.func @transform_4(%arg0: i32) -> (i32, i32) {
    %c0_i32 = arith.constant 0 : i32
    %c0_i32_0 = arith.constant 0 : i32
    return %c0_i32, %arg0 : i32, i32
  }
  func.func @transform_5(%arg0: i32) -> (i32, i32) {
    %c0_i32 = arith.constant 0 : i32
    %c0_i32_0 = arith.constant 0 : i32
    return %c0_i32, %arg0 : i32, i32
  }
}

</mosaic_0001>

<bundles_post_ra>
// kernel: gen_forward.5
= control target key start
LH: loop header
LB: loop body
LE: loop exit
PB: predicated region body
PF: predicated region fallthrough
CT: control target
= control target key end

     0   :  { %12 = vsyncpa [#allocation3], 0  ;;  %s524_s0 = inlined_call_operand.vmem [shape: f32[4,48], index: 0, kind: input, shape index: {}]   ;;  %s525_s1 = inlined_call_operand.vmem [shape: bf16[48,128], index: 1, kind: input, shape index: {}]   ;;  %s526_s2 = inlined_call_operand.vmem [shape: f32[1,128], index: 2, kind: input, shape index: {}]   ;;  %s527_s3 = inlined_call_operand.vmem [shape: bf16[128,64], index: 3, kind: input, shape index: {}]   ;;  %s528_s4 = inlined_call_operand.hbm [shape: f32[1,64], index: 4, kind: input, shape index: {}]   ;;  %s529_s5 = inlined_call_operand.hbm [shape: bf16[64,128], index: 5, kind: input, shape index: {}]   ;;  %s530_s6 = inlined_call_operand.hbm [shape: f32[1,128], index: 6, kind: input, shape index: {}]   ;;  %s531_s7 = inlined_call_operand.vmem [shape: f32[4,128], index: 7, kind: output, shape index: {}]  }
   0x1   :  { %13 = vsyncpa [#allocation5], 0  ;;  %s37_s26 = sshll.u32 %s529_s5, 4  ;;  %s428_s27 = smov [#allocation4]   ;;  %s38_s26 = int_to_ptr.hbm [resolvable:$true] %s37_s26 }
   0x2   :  { %s39_s28 = sshll.u32 %s428_s27, 4  ;;  %s27_s8 = sshll.u32 %s528_s4, 4  ;;  %s40_s28 = int_to_ptr.vmem [resolvable:$true] %s39_s28  ;;  %s28_s8 = int_to_ptr.hbm [resolvable:$true] %s27_s8 }
   0x3   :  { %s429_s9 = smov 64   ;;  %s430_s10 = smov 4  }
   0x4   :  { %45 = dma.hbm_to_vmem [thread:$0]  %s38_s26, 512, %s40_s28, [#allocation5], %s429_s9, %s429_s9, %s430_s10  }
   0x5   :  { %s431_s11 = smov [#allocation2]   ;;  %s51_s15 = sshll.u32 %s530_s6, 4  ;;  %s52_s15 = int_to_ptr.hbm [resolvable:$true] %s51_s15 }
   0x6   :  { %s29_s12 = sshll.u32 %s431_s11, 4  ;;  %s432_s5 = smov [#allocation6]   ;;  %s30_s12 = int_to_ptr.vmem [resolvable:$true] %s29_s12 }
   0x7   :  { %32 = dma.hbm_to_vmem [thread:$0]  %s28_s8, 16, %s30_s12, [#allocation3]  }
   0x8   :  { %s53_s16 = sshll.u32 %s432_s5, 4  ;;  %s54_s16 = int_to_ptr.vmem [resolvable:$true] %s53_s16 }
   0x9   :  { %56 = dma.hbm_to_vmem [thread:$0]  %s52_s15, 16, %s54_s16, [#allocation5]  }
   0xa   :  { %424 = dma.done.wait [#allocation3], 16  }
   0xb   :  { %425 = vsyncadd [#allocation3], 4294967280 }
   0xc   :  { %426 = dma.done.wait [#allocation5], 528  }
   0xd   :  { %427 = vsyncadd [#allocation5], 4294966768  ;;  %v331_v0 = vld [vmem:[%s525_s1 + $0x10] sm:$0xff]  ;;  %v339_v1 = vld [vmem:[%s527_s3 + $0x38] sm:$0xff]  ;;  %vm100_vm0 = vcmask 392192   ;;  %vm242_vm3 = vcmask 523264  }
   0xe   :  { %109 = vmatpush.bf16.msra.mxu0 %v331_v0  ;;  %v330_v2 = vld [vmem:[%s525_s1 + $0x8] sm:$0xff]  ;;  %189 = vmatpush.bf16.msra.mxu1 %v339_v1  ;;  %v338_v3 = vld [vmem:[%s527_s3 + $0x30] sm:$0xff]  ;;  %v329_v4 = vld [vmem:[%s525_s1] sm:$0xff] }
   0xf   :  { %v70_v5 = vld [vmem:[%s524_s0] sm:$0xf]  ;;  %v337_v6 = vld [vmem:[%s527_s3 + $0x28] sm:$0xff]  ;;  %v335_v9 = vld [vmem:[%s527_s3 + $0x18] sm:$0xff] }
  0x10   :  { %v78_v7 = vpack.c.bf16 %v70_v5, %v70_v5  ;;  %v336_v8 = vld [vmem:[%s527_s3 + $0x20] sm:$0xff]  ;;  %v334_v10 = vld [vmem:[%s527_s3 + $0x10] sm:$0xff]  ;;  %v333_v11 = vld [vmem:[%s527_s3 + $0x8] sm:$0xff] }
  0x11   :  { %v332_v12 = vld [vmem:[%s527_s3] sm:$0xff]  ;;  %v342_v14 = vld [vmem:[#allocation4 + $0x10] sm:$0xff]  ;;  %v341_v22 = vld [vmem:[#allocation4 + $0x8] sm:$0xff] }
  0x12   :  { %110 = vmatpush.bf16.msra.mxu0 %v330_v2  ;;  %190 = vmatpush.bf16.msra.mxu1 %v338_v3  ;;  %v343_v13 = vld [vmem:[#allocation4 + $0x18] sm:$0xff]  ;;  %v340_v23 = vld [vmem:[#allocation4] sm:$0xff] }
  0x13   :  { %250 = vmatpush.bf16.msra.mxu2 %v343_v13  ;;  %v349_v15 = vld [vmem:[%s526_s2] ss:$0 sm:$0xff]  ;;  %v351_v31 = vld [vmem:[#allocation6] ss:$0 sm:$0xff] }
  0x14   :  { %v350_v24 = vld [vmem:[#allocation2] ss:$0 sm:$0xff] }
  0x16   :  { %111 = vmatpush.bf16.msra.mxu0 %v329_v4  ;;  %191 = vmatpush.bf16.msra.mxu1 %v337_v6 }
  0x17   :  { %251 = vmatpush.bf16.msra.mxu2 %v342_v14 }
  0x19   :  { %279 = vmatmul.msk.bf16.vlgmr.msra.gmra.mxu0 %vm100_vm0, %v78_v7 }
  0x1a   :  { %192 = vmatpush.bf16.msra.mxu1 %v336_v8 }
  0x1b   :  { %252 = vmatpush.bf16.msra.mxu2 %v341_v22 }
  0x1e   :  { %193 = vmatpush.bf16.msra.mxu1 %v335_v9 }
  0x1f   :  { %253 = vmatpush.bf16.msra.mxu2 %v340_v23 }
  0x22   :  { %194 = vmatpush.bf16.msra.mxu1 %v334_v10 }
  0x26   :  { %195 = vmatpush.bf16.msra.mxu1 %v333_v11 }
  0x2a   :  { %196 = vmatpush.bf16.msra.mxu1 %v332_v12 }
  0x96   :  { %v113_v16 = vpop.f32.mrf.mxu0 }
  0x97   :  { %v114_v17 = vadd.f32 %v349_v15, %v113_v16 }
  0x99   :  { %v118_v18 = vmul.f32 0.2, %v114_v17  ;;  %vm117_vm1 = vcmp.gt.f32.partialorder %v114_v17, 0.0 }
  0x9b   :  { %v119_v19 = vsel %vm117_vm1, %v114_v17, %v118_v18 }
  0x9c   :  { %v137_v20 = vpack.c.bf16 %v119_v19, %v119_v19 }
  0x9e   :  { %v115_v21 = vpop.f32.mrf.mxu0  ;;  %197 = vmatmul.bf16.vlgmr.msra.gmra.mxu1 %v137_v20 }
 0x11b   :  { %v198_v25 = vpop.f32.mrf.mxu1 }
 0x11c   :  { %v199_v26 = vadd.f32 %v350_v24, %v198_v25 }
 0x11e   :  { %vm202_vm2 = vcmp.gt.f32.partialorder %v199_v26, 0.0  ;;  %v203_v27 = vmul.f32 0.2, %v199_v26 }
 0x120   :  { %v204_v28 = vsel %vm202_vm2, %v199_v26, %v203_v27 }
 0x121   :  { %v214_v29 = vpack.c.bf16 %v204_v28, %v204_v28 }
 0x123   :  { %v200_v30 = vpop.f32.mrf.mxu1  ;;  %328 = vmatmul.msk.bf16.vlgmr.msra.gmra.mxu2 %vm242_vm3, %v214_v29 }
 0x1a6   :  { %v255_v32 = vpop.f32.mrf.mxu2 }
 0x1a7   :  { %v256_v33 = vadd.f32 %v351_v31, %v255_v32 }
 0x1a9   :  { %v259_v34 = vmax.f32 %v256_v33, 0.0 }
 0x1ab   :  { %260 = vst [vmem:[%s531_s7] sm:$0xf] %v259_v34 }
 0x1ae   :  { %v257_v35 = vpop.f32.mrf.mxu2 }
 0x1af   :  { %265 = vsyncpa [#allocation3], 1 }
 0x1b0   :  { %266 = vsyncpa [#allocation5], 1 }

// kernel: gen_forward.6
= control target key start
LH: loop header
LB: loop body
LE: loop exit
PB: predicated region body
PF: predicated region fallthrough
CT: control target
= control target key end

     0   :  { %12 = vsyncpa [#allocation3], 0  ;;  %s1376_s0 = inlined_call_operand.vmem [shape: f32[8,128], index: 0, kind: input, shape index: {}]   ;;  %s1377_s1 = inlined_call_operand.vmem [shape: bf16[128,128], index: 1, kind: input, shape index: {}]   ;;  %s1378_s2 = inlined_call_operand.vmem [shape: f32[1,128], index: 2, kind: input, shape index: {}]   ;;  %s1379_s3 = inlined_call_operand.vmem [shape: bf16[128,256], index: 3, kind: input, shape index: {}]   ;;  %s1380_s4 = inlined_call_operand.vmem [shape: f32[1,256], index: 4, kind: input, shape index: {}]   ;;  %s1381_s5 = inlined_call_operand.hbm [shape: bf16[256,256], index: 5, kind: input, shape index: {}]   ;;  %s1382_s6 = inlined_call_operand.vmem [shape: f32[1,256], index: 6, kind: input, shape index: {}]   ;;  %s1383_s7 = inlined_call_operand.vmem [shape: f32[8,256], index: 7, kind: output, shape index: {}]  }
   0x1   :  { %14 = vsyncpa [#allocation3 + $0x1], 0  ;;  %s1132_s24 = smov 0   ;;  %s1134_s25 = smov 0  }
   0x2   :  { %s1136_s26 = smov 0   ;;  %s1138_s27 = smov 0  }
   0x3 LB: > { %s1151_s28 = sadd.s32 4294967295, %s1087_s27   ;;  %s1154_s29 = sadd.s32 1, %s1087_s27   ;;  %s1087_s27 = sphi %s1138_s27, %s1390_s27   ;;  %s1083_s26 = sphi %s1136_s26, %s1389_s26   ;;  %s1079_s25 = sphi %s1134_s25, %s1388_s25   ;;  %s1075_s24 = sphi %s1132_s24, %s1387_s24  }
   0x4   : > { %s129_s30 = ssub.s32 %s1087_s27, %s1154_s29  ;;  %s132_s8 = sadd.s32 1, %s1083_s26 }
   0x5   : > { %p130_p0 = scmp.eq.s32.totalorder %s129_s30, 0  ;;  %p139_p1 = scmp.ne.s32.totalorder %s1083_s26, %s1079_s25 }
   0x6   : > { %p140_p2 = scmp.eq.s32.totalorder %s1087_s27, 0  ;;  %p145_p3 = scmp.ne.s32.totalorder %s1079_s25, %s1075_s24 }
   0x7   : > { %s1164_s9 = scalar_select %p130_p0, %s1083_s26, %s132_s8  }
   0x8   : > { %p1166_p4 = por %p140_p2, %p139_p1  ;;  %p146_p5 = scmp.eq.s32.totalorder %s1151_s28, 0 }
   0x9   : > { %p985_p6 = scmp.lt.s32.totalorder %s1087_s27, 2  ;;  %s236_s12 = sand.u32 1, %s1083_s26  }
   0xa   : > { %p1172_p7 = por %p146_p5, %p145_p3  ;;  %s772_s13 = sshll.u32 %s236_s12, 7 }
   0xb   : > { %s773_s14 = sshll.u32 %s1087_s27, 2  ;;  %s240_s18 = scalar_lea.vmem [#allocation2], %s772_s13 }
   0xc   : > { %s244_s17 = scalar_lea.hbm %s1381_s5, %s773_s14  ;;  %s247_s19 = sshll.u32 %s240_s18, 4  ;;  %s248_s19 = int_to_ptr.vmem [resolvable:$true] %s247_s19 }
   0xd   : > { %s245_s20 = sshll.u32 %s244_s17, 4  ;;  %p1183_p8 = pnand %p985_p6, %p1166_p4  ;;  %s246_s20 = int_to_ptr.hbm [resolvable:$true] %s245_s20 }
   0xe   : > { %s237_s22 = scalar_lea.sflag [#allocation3], %s236_s12  ;;  %s1023_s23 = sshra.s32 %s246_s20, 4  ;;  %s1024_s23 = int_to_ptr.hbm [resolvable:$true] %s1023_s23 }
   0xf   : > { %s1025_s24 = scalar_lea.hbm %s1024_s23, 128  ;;  %p1027_p10 = pneg %p1183_p8 }
  0x10   : > { %p1026_p9 = scmp.ne.s32.totalorder %s1024_s23, %s1025_s24  ;;  %s1030_s13 = scalar_lea.hbm %s1381_s5, 256 }
  0x11   : > { %p1031_p13 = scmp.lt.s32.totalorder %s1024_s23, %s1381_s5  ;;  %p1032_p0 = scmp.lt.s32.totalorder %s1030_s13, %s1025_s24 }
  0x12   : > { %p1028_p11 = pnand %p1027_p10, %p1026_p9 }
  0x13   : > { %p1033_p1 = por %p1032_p0, %p1031_p13 }
  0x14   : > { %p1029_p12 = pneg %p1028_p11 }
  0x16   : > { %p1034_p2 = pnand %p1033_p1, %p1029_p12 }
  0x18   : > { %1037 = shalt.err (!%p1034_p2)
}
  0x19   : > { %s1089_s12 = smov 128   ;;  %s1090_s15 = smov 64  }
  0x1a   : > { %s1091_s16 = smov 4   ;;  %p774_p3 = scmp.ge.s32.totalorder %s1087_s27, 1 }
  0x1b   : > { %984 = dma.hbm_to_vmem [thread:$0]  (!%p1183_p8), %s246_s20, 2048, %s248_s19, %s237_s22, %s1089_s12, %s1090_s15, %s1091_s16  }
  0x1c   : > { %p261_p4 = scmp.lt.s32.totalorder %s1087_s27, 3 }
  0x1e   : > { %p262_p5 = pnand %p774_p3, %p261_p4 }
  0x1f   : > { %s267_s17 = sand.u32 (!%p262_p5), 1, %s1079_s25  }
  0x20   : > { %265 = sbr.rel (%p262_p5) target bundleno = 476 (0x1dc), region = 48  ;;  %s775_s18 = sshll.u32 (!%p262_p5), %s267_s17, 7 }
  0x21   : > { %s268_s23 = scalar_lea.sflag (!%p262_p5), [#allocation3], %s267_s17  ;;  %s1200_s24 = scalar_lea.vmem (!%p262_p5), [#allocation2], %s775_s18 }
  0x25   : > { %1070 = dma.done.wait (%p1172_p7), %s268_s23, 2048  }
  0x26   : > { %1072 = vsyncadd (%p1172_p7), %s268_s23, 4294965248  ;;  %v946_v0 = vld [vmem:[%s1377_s1 + $0x38] sm:$0xff]  ;;  %v945_v1 = vld [vmem:[%s1377_s1 + $0x30] sm:$0xff]  ;;  %p305_p6 = scmp.lt.s32.totalorder %s1151_s28, 1 }
  0x27   : > { %382 = vmatpush.bf16.msra.mxu0 %v946_v0  ;;  %v867_v2 = vld [vmem:[%s1379_s3 + $0x70] sm:$0xf]  ;;  %v962_v3 = vld [vmem:[%s1379_s3 + $0x74] sm:$0xf0]  ;;  %v961_v4 = vld [vmem:[%s1379_s3 + $0x74] sm:$0xf] }
  0x28   : > { %v868_v5 = vor.u32 %v962_v3, %v867_v2  ;;  %v869_v6 = vld [vmem:[%s1379_s3 + $0x78] sm:$0xf0]  ;;  %v859_v7 = vld [vmem:[%s1379_s3 + $0x60] sm:$0xf]  ;;  %v960_v8 = vld [vmem:[%s1379_s3 + $0x64] sm:$0xf0] }
  0x29   : > { %v872_v9 = vor.u32 %v961_v4, %v869_v6  ;;  %v959_v10 = vld [vmem:[%s1379_s3 + $0x64] sm:$0xf]  ;;  %v861_v11 = vld [vmem:[%s1379_s3 + $0x68] sm:$0xf0]  ;;  %v860_v13 = vor.u32 %v960_v8, %v859_v7  ;;  %v851_v15 = vld [vmem:[%s1379_s3 + $0x50] sm:$0xf] }
  0x2a   : > { %v944_v12 = vld [vmem:[%s1377_s1 + $0x28] sm:$0xff]  ;;  %501 = vmatpush.bf16.msra.mxu1 %v868_v5  ;;  %v864_v14 = vor.u32 %v959_v10, %v861_v11  ;;  %v958_v16 = vld [vmem:[%s1379_s3 + $0x54] sm:$0xf0]  ;;  %v957_v17 = vld [vmem:[%s1379_s3 + $0x54] sm:$0xf]  ;;  %s1392_s28 = smov (!%p305_p6, %s1151_s28), 1 }
  0x2b   : > { %383 = vmatpush.bf16.msra.mxu0 %v945_v1  ;;  %514 = vmatpush.bf16.msra.mxu2 %v872_v9  ;;  %v853_v18 = vld [vmem:[%s1379_s3 + $0x58] sm:$0xf0]  ;;  %v943_v19 = vld [vmem:[%s1377_s1 + $0x20] sm:$0xff]  ;;  %v852_v20 = vor.u32 %v958_v16, %v851_v15  ;;  %v956_v23 = vld [vmem:[%s1379_s3 + $0x44] sm:$0xf0]  ;;  %s307_s8 = scalar_lea.vmem %s1382_s6, %s1392_s28 }
  0x2c   : > { %v856_v21 = vor.u32 %v957_v17, %v853_v18  ;;  %v843_v22 = vld [vmem:[%s1379_s3 + $0x40] sm:$0xf]  ;;  %v955_v24 = vld [vmem:[%s1379_s3 + $0x44] sm:$0xf]  ;;  %v845_v25 = vld [vmem:[%s1379_s3 + $0x48] sm:$0xf0] }
  0x2d   : > { %v942_v26 = vld [vmem:[%s1377_s1 + $0x18] sm:$0xff]  ;;  %v844_v27 = vor.u32 %v956_v23, %v843_v22  ;;  %v848_v28 = vor.u32 %v955_v24, %v845_v25  ;;  %v835_v29 = vld [vmem:[%s1379_s3 + $0x30] sm:$0xf]  ;;  %v953_v31 = vld [vmem:[%s1379_s3 + $0x34] sm:$0xf] }
  0x2e   : > { %502 = vmatpush.bf16.msra.mxu1 %v860_v13  ;;  %v954_v30 = vld [vmem:[%s1379_s3 + $0x34] sm:$0xf0]  ;;  %v837_v32 = vld [vmem:[%s1379_s3 + $0x38] sm:$0xf0]  ;;  %v941_v33 = vld [vmem:[%s1377_s1 + $0x10] sm:$0xff] }
  0x2f   : > { %384 = vmatpush.bf16.msra.mxu0 %v944_v12  ;;  %515 = vmatpush.bf16.msra.mxu2 %v864_v14  ;;  %v836_v34 = vor.u32 %v954_v30, %v835_v29  ;;  %v840_v35 = vor.u32 %v953_v31, %v837_v32  ;;  %v827_v36 = vld [vmem:[%s1379_s3 + $0x20] sm:$0xf]  ;;  %v952_v37 = vld [vmem:[%s1379_s3 + $0x24] sm:$0xf0]  ;;  %v951_v38 = vld [vmem:[%s1379_s3 + $0x24] sm:$0xf] }
  0x30   : > { %v829_v39 = vld [vmem:[%s1379_s3 + $0x28] sm:$0xf0]  ;;  %v828_v41 = vor.u32 %v952_v37, %v827_v36  ;;  %v939_v43 = vld [vmem:[%s1377_s1] sm:$0xff]  ;;  %v819_v46 = vld [vmem:[%s1379_s3 + $0x10] sm:$0xf] }
  0x31   : > { %v940_v40 = vld [vmem:[%s1377_s1 + $0x8] sm:$0xff]  ;;  %v832_v42 = vor.u32 %v951_v38, %v829_v39  ;;  %v312_v44 = vld [vmem:[%s1376_s0] sm:$0xff]  ;;  %v950_v47 = vld [vmem:[%s1379_s3 + $0x14] sm:$0xf0] }
  0x32   : > { %503 = vmatpush.bf16.msra.mxu1 %v852_v20  ;;  %v330_v45 = vpack.c.bf16 %v312_v44, %v312_v44  ;;  %v949_v48 = vld [vmem:[%s1379_s3 + $0x14] sm:$0xf]  ;;  %v820_v49 = vor.u32 %v950_v47, %v819_v46  ;;  %v821_v50 = vld [vmem:[%s1379_s3 + $0x18] sm:$0xf0]  ;;  %v811_v52 = vld [vmem:[%s1379_s3] sm:$0xf] }
  0x33   : > { %385 = vmatpush.bf16.msra.mxu0 %v943_v19  ;;  %516 = vmatpush.bf16.msra.mxu2 %v856_v21  ;;  %v824_v51 = vor.u32 %v949_v48, %v821_v50  ;;  %v948_v53 = vld [vmem:[%s1379_s3 + $0x4] sm:$0xf0]  ;;  %v947_v54 = vld [vmem:[%s1379_s3 + $0x4] sm:$0xf]  ;;  %v813_v56 = vld [vmem:[%s1379_s3 + $0x8] sm:$0xf0] }
  0x34   : > { %v812_v55 = vor.u32 %v948_v53, %v811_v52  ;;  %v816_v57 = vor.u32 %v947_v54, %v813_v56  ;;  %v970_v58 = vld [vmem:[%s1200_s24 + $0x38] sm:$0xff]  ;;  %v969_v60 = vld [vmem:[%s1200_s24 + $0x30] sm:$0xff]  ;;  %v968_v62 = vld [vmem:[%s1200_s24 + $0x28] sm:$0xff] }
  0x35   : > { %v978_v59 = vld [vmem:[%s1200_s24 + $0x78] sm:$0xff]  ;;  %667 = vmatpush.bf16.msra.mxu3 %v970_v58  ;;  %v977_v61 = vld [vmem:[%s1200_s24 + $0x70] sm:$0xff]  ;;  %v976_v63 = vld [vmem:[%s1200_s24 + $0x68] sm:$0xff] }
  0x36   : > { %504 = vmatpush.bf16.msra.mxu1 %v844_v27  ;;  %v967_v0 = vld [vmem:[%s1200_s24 + $0x20] sm:$0xff]  ;;  %v966_v2 = vld [vmem:[%s1200_s24 + $0x18] sm:$0xff]  ;;  %v965_v4 = vld [vmem:[%s1200_s24 + $0x10] sm:$0xff] }
  0x37   : > { %386 = vmatpush.bf16.msra.mxu0 %v942_v26  ;;  %517 = vmatpush.bf16.msra.mxu2 %v848_v28  ;;  %v975_v1 = vld [vmem:[%s1200_s24 + $0x60] sm:$0xff]  ;;  %v974_v3 = vld [vmem:[%s1200_s24 + $0x58] sm:$0xff]  ;;  %v964_v12 = vld [vmem:[%s1200_s24 + $0x8] sm:$0xff] }
  0x38   : > { %v1021_v5 = vld [vmem:[%s1378_s2] ss:$0 sm:$0xff]  ;;  %v973_v13 = vld [vmem:[%s1200_s24 + $0x50] sm:$0xff]  ;;  %v972_v15 = vld [vmem:[%s1200_s24 + $0x48] sm:$0xff] }
  0x39   : > { %668 = vmatpush.bf16.msra.mxu3 %v969_v60  ;;  %v963_v14 = vld [vmem:[%s1200_s24] sm:$0xff] }
  0x3a   : > { %505 = vmatpush.bf16.msra.mxu1 %v836_v34  ;;  %v971_v16 = vld [vmem:[%s1200_s24 + $0x40] sm:$0xff]  ;;  %s776_s24 = sshll.u32 %s1392_s28, 3 }
  0x3b   : > { %387 = vmatpush.bf16.msra.mxu0 %v941_v33  ;;  %518 = vmatpush.bf16.msra.mxu2 %v840_v35  ;;  %v414_v17 = vld [vmem:[%s1380_s4] sm:$0x3]  ;;  %s311_s22 = scalar_lea.vmem %s1383_s7, %s776_s24 }
  0x3c   : > { %v417_v18 = vperm.slane %v414_v17, 0  ;;  %v418_v22 = vperm.slane %v414_v17, 1  ;;  %v1022_v32 = vld [vmem:[%s307_s8] ss:$0 sm:$0xff] }
  0x3d   : > { %669 = vmatpush.bf16.msra.mxu3 %v968_v62 }
  0x3e   : > { %506 = vmatpush.bf16.msra.mxu1 %v828_v41 }
  0x3f   : > { %388 = vmatpush.bf16.msra.mxu0 %v940_v40  ;;  %519 = vmatpush.bf16.msra.mxu2 %v832_v42 }
  0x41   : > { %670 = vmatpush.bf16.msra.mxu3 %v967_v0 }
  0x42   : > { %507 = vmatpush.bf16.msra.mxu1 %v820_v49 }
  0x43   : > { %389 = vmatpush.bf16.msra.mxu0 %v939_v43  ;;  %520 = vmatpush.bf16.msra.mxu2 %v824_v51 }
  0x45   : > { %671 = vmatpush.bf16.msra.mxu3 %v966_v2 }
  0x46   : > { %390 = vmatmul.bf16.vlgmr.msra.gmra.mxu0 %v330_v45  ;;  %508 = vmatpush.bf16.msra.mxu1 %v812_v55 }
  0x47   : > { %521 = vmatpush.bf16.msra.mxu2 %v816_v57  ;;  %680 = vmatpush.bf16.msrb.mxu0 %v978_v59 }
  0x49   : > { %672 = vmatpush.bf16.msra.mxu3 %v965_v4 }
  0x4b   : > { %681 = vmatpush.bf16.msrb.mxu0 %v977_v61 }
  0x4d   : > { %673 = vmatpush.bf16.msra.mxu3 %v964_v12 }
  0x4f   : > { %682 = vmatpush.bf16.msrb.mxu0 %v976_v63 }
  0x51   : > { %674 = vmatpush.bf16.msra.mxu3 %v963_v14 }
  0x53   : > { %683 = vmatpush.bf16.msrb.mxu0 %v975_v1 }
  0x57   : > { %684 = vmatpush.bf16.msrb.mxu0 %v974_v3 }
  0x5b   : > { %685 = vmatpush.bf16.msrb.mxu0 %v973_v13 }
  0x5f   : > { %686 = vmatpush.bf16.msrb.mxu0 %v972_v15 }
  0x63   : > { %687 = vmatpush.bf16.msrb.mxu0 %v971_v16 }
  0xc3   : > { %v391_v6 = vpop.f32.mrf.mxu0 }
  0xc4   : > { %v392_v7 = vadd.f32 %v1021_v5, %v391_v6 }
  0xc6   : > { %v396_v8 = vmul.f32 0.2, %v392_v7  ;;  %vm395_vm0 = vcmp.gt.f32.partialorder %v392_v7, 0.0 }
  0xc8   : > { %v397_v9 = vsel %vm395_vm0, %v392_v7, %v396_v8 }
  0xc9   : > { %v415_v10 = vpack.c.bf16 %v397_v9, %v397_v9 }
  0xcb   : > { %v393_v11 = vpop.f32.mrf.mxu0  ;;  %509 = vmatmul.bf16.vlgmr.msra.gmra.mxu1 %v415_v10  ;;  %522 = vmatmul.bf16.vlgmr.msra.gmra.mxu2 %v415_v10 }
 0x148   : > { %v510_v19 = vpop.f32.mrf.mxu1 }
 0x149   : > { %v511_v20 = vadd.f32 %v510_v19, %v417_v18 }
 0x14b   : > { %v529_v21 = vmul.f32 0.2, %v511_v20  ;;  %vm527_vm1 = vcmp.gt.f32.partialorder %v511_v20, 0.0 }
 0x14d   : > { %v531_v23 = vsel %vm527_vm1, %v511_v20, %v529_v21 }
 0x14e   : > { %v523_v24 = vpop.f32.mrf.mxu2  ;;  %v566_v25 = vpack.c.bf16 %v531_v23, %v531_v23 }
 0x14f   : > { %v524_v26 = vadd.f32 %v523_v24, %v418_v22 }
 0x150   : > { %v512_v27 = vpop.f32.mrf.mxu1  ;;  %675 = vmatmul.bf16.vlgmr.msra.gmra.mxu3 %v566_v25 }
 0x151   : > { %vm528_vm2 = vcmp.gt.f32.partialorder %v524_v26, 0.0  ;;  %v530_v28 = vmul.f32 0.2, %v524_v26 }
 0x153   : > { %v532_v29 = vsel %vm528_vm2, %v524_v26, %v530_v28 }
 0x154   : > { %v567_v30 = vpack.c.bf16 %v532_v29, %v532_v29 }
 0x156   : > { %v525_v31 = vpop.f32.mrf.mxu2  ;;  %688 = vmatmul.bf16.vlgmr.msrb.gmra.mxu0 %v567_v30 }
 0x1d3   : > { %v676_v33 = vpop.f32.mrf.mxu3  ;;  %v689_v34 = vpop.f32.mrf.mxu0 }
 0x1d4   : > { %v677_v35 = vadd.f32 %v1022_v32, %v676_v33 }
 0x1d6   : > { %v690_v36 = vadd.f32 %v689_v34, %v677_v35 }
 0x1d8   : > { %v693_v37 = vmax.f32 %v690_v36, 0.0 }
 0x1da   : > { %694 = vst [vmem:[%s311_s22] sm:$0xff] %v693_v37 }
 0x1db   : > { %v678_v38 = vpop.f32.mrf.mxu3  ;;  %v691_v39 = vpop.f32.mrf.mxu0 }
 0x1dc PF: > { %p17_p7 = scmp.ge.s32.totalorder %s1154_s29, 4   ;;  %s1387_s24 = smov %s1079_s25 }
 0x1dd   : > { %s1388_s25 = smov %s1083_s26  ;;  %s1389_s26 = smov %s1164_s9 }
 0x1de   : > { %s1390_s27 = smov %s1154_s29  ;;  %19 = sbr.rel (!%p17_p7) target bundleno = 3 (0x3), region = 91 }
 0x1e3   :  { %714 = vsyncpa [#allocation3], 1 }
 0x1e4   :  { %716 = vsyncpa [#allocation3 + $0x1], 1 }

// kernel: gen_forward.4
= control target key start
LH: loop header
LB: loop body
LE: loop exit
PB: predicated region body
PF: predicated region fallthrough
CT: control target
= control target key end

     0   :  { %12 = vsyncpa [#allocation3], 0  ;;  %s1191_s0 = inlined_call_operand.hbm [shape: f32[4,256], index: 0, kind: input, shape index: {}]   ;;  %s1192_s1 = inlined_call_operand.hbm [shape: bf16[256,256], index: 1, kind: input, shape index: {}]   ;;  %s1193_s2 = inlined_call_operand.hbm [shape: f32[1,256], index: 2, kind: input, shape index: {}]   ;;  %s1194_s3 = inlined_call_operand.hbm [shape: bf16[256,128], index: 3, kind: input, shape index: {}]   ;;  %s1195_s4 = inlined_call_operand.hbm [shape: f32[1,128], index: 4, kind: input, shape index: {}]   ;;  %s1196_s5 = inlined_call_operand.hbm [shape: bf16[128,128], index: 5, kind: input, shape index: {}]   ;;  %s1197_s6 = inlined_call_operand.hbm [shape: f32[1,128], index: 6, kind: input, shape index: {}]   ;;  %s1198_s7 = inlined_call_operand.vmem [shape: f32[4,128], index: 7, kind: output, shape index: {}]  }
   0x1   :  { %13 = vsyncpa [#allocation5], 0 }
   0x2   :  { %14 = vsyncpa [#allocation8], 0  ;;  %s31_s26 = sshll.u32 %s1192_s1, 4  ;;  %s32_s26 = int_to_ptr.hbm [resolvable:$true] %s31_s26 }
   0x3   :  { %15 = vsyncpa [#allocation11], 0  ;;  %s1116_s27 = smov [#allocation4]   ;;  %s55_s8 = sshll.u32 %s1194_s3, 4  ;;  %s56_s8 = int_to_ptr.hbm [resolvable:$true] %s55_s8 }
   0x4   :  { %s33_s28 = sshll.u32 %s1116_s27, 4  ;;  %s1117_s9 = smov 128   ;;  %s34_s28 = int_to_ptr.vmem [resolvable:$true] %s33_s28 }
   0x5   :  { %s1118_s10 = smov 8   ;;  %s1119_s11 = smov [#allocation7]  }
   0x6   :  { %39 = dma.hbm_to_vmem [thread:$0]  %s32_s26, 4096, %s34_s28, [#allocation5], %s1117_s9, %s1117_s9, %s1118_s10  }
   0x7   :  { %s57_s12 = sshll.u32 %s1119_s11, 4  ;;  %s1120_s13 = smov 64   ;;  %s58_s12 = int_to_ptr.vmem [resolvable:$true] %s57_s12 }
   0x8   :  { %s1121_s14 = smov 4   ;;  %s79_s16 = sshll.u32 %s1196_s5, 4  ;;  %s80_s16 = int_to_ptr.hbm [resolvable:$true] %s79_s16 }
   0x9   :  { %63 = dma.hbm_to_vmem [thread:$0]  %s56_s8, 2048, %s58_s12, [#allocation8], %s1120_s13, %s1120_s13, %s1121_s14  }
   0xa   :  { %s1122_s17 = smov [#allocation10]   ;;  %s21_s20 = sshll.u32 %s1191_s0, 4  ;;  %s22_s20 = int_to_ptr.hbm [resolvable:$true] %s21_s20 }
   0xb   :  { %s81_s18 = sshll.u32 %s1122_s17, 4  ;;  %s1123_s21 = smov [#allocation2]   ;;  %s82_s18 = int_to_ptr.vmem [resolvable:$true] %s81_s18 }
   0xc   :  { %87 = dma.hbm_to_vmem [thread:$0]  %s80_s16, 1024, %s82_s18, [#allocation11], %s1120_s13, %s1120_s13, %s1121_s14  }
   0xd   :  { %s23_s22 = sshll.u32 %s1123_s21, 4  ;;  %s45_s25 = sshll.u32 %s1193_s2, 4  ;;  %s24_s22 = int_to_ptr.vmem [resolvable:$true] %s23_s22  ;;  %s46_s25 = int_to_ptr.hbm [resolvable:$true] %s45_s25 }
   0xe   :  { %26 = dma.hbm_to_vmem [thread:$0]  %s22_s20, 128, %s24_s22, [#allocation3]  }
   0xf   :  { %s69_s27 = sshll.u32 %s1195_s4, 4  ;;  %s1124_s28 = smov [#allocation6]   ;;  %s70_s27 = int_to_ptr.hbm [resolvable:$true] %s69_s27 }
  0x10   :  { %s47_s29 = sshll.u32 %s1124_s28, 4  ;;  %s1125_s0 = smov [#allocation9]   ;;  %s48_s29 = int_to_ptr.vmem [resolvable:$true] %s47_s29 }
  0x11   :  { %50 = dma.hbm_to_vmem [thread:$0]  %s46_s25, 32, %s48_s29, [#allocation5]  }
  0x12   :  { %s71_s30 = sshll.u32 %s1125_s0, 4  ;;  %s93_s10 = sshll.u32 %s1197_s6, 4  ;;  %s72_s30 = int_to_ptr.vmem [resolvable:$true] %s71_s30  ;;  %s94_s10 = int_to_ptr.hbm [resolvable:$true] %s93_s10 }
  0x13   :  { %74 = dma.hbm_to_vmem [thread:$0]  %s70_s27, 16, %s72_s30, [#allocation8]  }
  0x14   :  { %s1126_s2 = smov [#allocation12]  }
  0x15   :  { %s95_s11 = sshll.u32 %s1126_s2, 4  ;;  %s96_s11 = int_to_ptr.vmem [resolvable:$true] %s95_s11 }
  0x16   :  { %98 = dma.hbm_to_vmem [thread:$0]  %s94_s10, 16, %s96_s11, [#allocation11]  }
  0x17   :  { %1108 = dma.done.wait [#allocation3], 128  }
  0x18   :  { %1109 = vsyncadd [#allocation3], 4294967168 }
  0x19   :  { %1110 = dma.done.wait [#allocation5], 4128  }
  0x1a   :  { %1111 = vsyncadd [#allocation5], 4294963168 }
  0x1b   :  { %1112 = dma.done.wait [#allocation8], 2064  }
  0x1c   :  { %1113 = vsyncadd [#allocation8], 4294965232 }
  0x1d   :  { %1114 = dma.done.wait [#allocation11], 1040  }
  0x1e   :  { %1115 = vsyncadd [#allocation11], 4294966256  ;;  %v705_v0 = vld [vmem:[#allocation4 + $0x70] sm:$0xf]  ;;  %v886_v1 = vld [vmem:[#allocation4 + $0x74] sm:$0xf0] }
  0x1f   :  { %v769_v2 = vld [vmem:[#allocation4 + $0xf0] sm:$0xf]  ;;  %v706_v3 = vor.u32 %v886_v1, %v705_v0  ;;  %v902_v4 = vld [vmem:[#allocation4 + $0xf4] sm:$0xf0]  ;;  %v885_v5 = vld [vmem:[#allocation4 + $0x74] sm:$0xf] }
  0x20   :  { %v707_v6 = vld [vmem:[#allocation4 + $0x78] sm:$0xf0]  ;;  %v770_v7 = vor.u32 %v902_v4, %v769_v2  ;;  %v901_v9 = vld [vmem:[#allocation4 + $0xf4] sm:$0xf]  ;;  %v697_v11 = vld [vmem:[#allocation4 + $0x60] sm:$0xf] }
  0x21   :  { %v710_v8 = vor.u32 %v885_v5, %v707_v6  ;;  %v771_v10 = vld [vmem:[#allocation4 + $0xf8] sm:$0xf0]  ;;  %334 = vmatpush.bf16.msra.mxu0 %v706_v3  ;;  %v884_v13 = vld [vmem:[#allocation4 + $0x64] sm:$0xf0]  ;;  %v761_v14 = vld [vmem:[#allocation4 + $0xe0] sm:$0xf] }
  0x22   :  { %v774_v12 = vor.u32 %v901_v9, %v771_v10  ;;  %v900_v15 = vld [vmem:[#allocation4 + $0xe4] sm:$0xf0]  ;;  %347 = vmatpush.bf16.msra.mxu1 %v770_v7  ;;  %v698_v16 = vor.u32 %v884_v13, %v697_v11  ;;  %v883_v18 = vld [vmem:[#allocation4 + $0x64] sm:$0xf]  ;;  %v699_v19 = vld [vmem:[#allocation4 + $0x68] sm:$0xf0] }
  0x23   :  { %360 = vmatpush.bf16.msra.mxu2 %v710_v8  ;;  %v762_v17 = vor.u32 %v900_v15, %v761_v14  ;;  %v899_v20 = vld [vmem:[#allocation4 + $0xe4] sm:$0xf]  ;;  %v702_v21 = vor.u32 %v883_v18, %v699_v19  ;;  %v763_v22 = vld [vmem:[#allocation4 + $0xe8] sm:$0xf0]  ;;  %v689_v23 = vld [vmem:[#allocation4 + $0x50] sm:$0xf] }
  0x24   :  { %373 = vmatpush.bf16.msra.mxu3 %v774_v12  ;;  %v882_v24 = vld [vmem:[#allocation4 + $0x54] sm:$0xf0]  ;;  %v766_v25 = vor.u32 %v899_v20, %v763_v22  ;;  %v753_v26 = vld [vmem:[#allocation4 + $0xd0] sm:$0xf]  ;;  %v881_v28 = vld [vmem:[#allocation4 + $0x54] sm:$0xf] }
  0x25   :  { %v898_v27 = vld [vmem:[#allocation4 + $0xd4] sm:$0xf0]  ;;  %335 = vmatpush.bf16.msra.mxu0 %v698_v16  ;;  %v690_v29 = vor.u32 %v882_v24, %v689_v23  ;;  %v691_v30 = vld [vmem:[#allocation4 + $0x58] sm:$0xf0]  ;;  %v897_v31 = vld [vmem:[#allocation4 + $0xd4] sm:$0xf] }
  0x26   :  { %v755_v32 = vld [vmem:[#allocation4 + $0xd8] sm:$0xf0]  ;;  %348 = vmatpush.bf16.msra.mxu1 %v762_v17  ;;  %v754_v33 = vor.u32 %v898_v27, %v753_v26  ;;  %v694_v34 = vor.u32 %v881_v28, %v691_v30  ;;  %v681_v35 = vld [vmem:[#allocation4 + $0x40] sm:$0xf]  ;;  %v880_v36 = vld [vmem:[#allocation4 + $0x44] sm:$0xf0] }
  0x27   :  { %361 = vmatpush.bf16.msra.mxu2 %v702_v21  ;;  %v745_v37 = vld [vmem:[#allocation4 + $0xc0] sm:$0xf]  ;;  %v758_v38 = vor.u32 %v897_v31, %v755_v32  ;;  %v896_v39 = vld [vmem:[#allocation4 + $0xc4] sm:$0xf0]  ;;  %v879_v40 = vld [vmem:[#allocation4 + $0x44] sm:$0xf]  ;;  %v682_v44 = vor.u32 %v880_v36, %v681_v35 }
  0x28   :  { %374 = vmatpush.bf16.msra.mxu3 %v766_v25  ;;  %v683_v41 = vld [vmem:[#allocation4 + $0x48] sm:$0xf0]  ;;  %v895_v42 = vld [vmem:[#allocation4 + $0xc4] sm:$0xf]  ;;  %v746_v45 = vor.u32 %v896_v39, %v745_v37  ;;  %v673_v47 = vld [vmem:[#allocation4 + $0x30] sm:$0xf] }
  0x29   :  { %v747_v43 = vld [vmem:[#allocation4 + $0xc8] sm:$0xf0]  ;;  %336 = vmatpush.bf16.msra.mxu0 %v690_v29  ;;  %v686_v46 = vor.u32 %v879_v40, %v683_v41  ;;  %v878_v48 = vld [vmem:[#allocation4 + $0x34] sm:$0xf0]  ;;  %v737_v49 = vld [vmem:[#allocation4 + $0xb0] sm:$0xf] }
  0x2a   :  { %349 = vmatpush.bf16.msra.mxu1 %v754_v33  ;;  %v750_v50 = vor.u32 %v895_v42, %v747_v43  ;;  %v894_v51 = vld [vmem:[#allocation4 + $0xb4] sm:$0xf0]  ;;  %v877_v52 = vld [vmem:[#allocation4 + $0x34] sm:$0xf]  ;;  %v675_v53 = vld [vmem:[#allocation4 + $0x38] sm:$0xf0]  ;;  %v674_v56 = vor.u32 %v878_v48, %v673_v47 }
  0x2b   :  { %362 = vmatpush.bf16.msra.mxu2 %v694_v34  ;;  %v893_v54 = vld [vmem:[#allocation4 + $0xb4] sm:$0xf]  ;;  %v739_v55 = vld [vmem:[#allocation4 + $0xb8] sm:$0xf0]  ;;  %v738_v57 = vor.u32 %v894_v51, %v737_v49  ;;  %v678_v58 = vor.u32 %v877_v52, %v675_v53  ;;  %v665_v59 = vld [vmem:[#allocation4 + $0x20] sm:$0xf] }
  0x2c   :  { %375 = vmatpush.bf16.msra.mxu3 %v758_v38  ;;  %v876_v60 = vld [vmem:[#allocation4 + $0x24] sm:$0xf0]  ;;  %v729_v61 = vld [vmem:[#allocation4 + $0xa0] sm:$0xf]  ;;  %v742_v62 = vor.u32 %v893_v54, %v739_v55  ;;  %v875_v0 = vld [vmem:[#allocation4 + $0x24] sm:$0xf] }
  0x2d   :  { %337 = vmatpush.bf16.msra.mxu0 %v682_v44  ;;  %v892_v63 = vld [vmem:[#allocation4 + $0xa4] sm:$0xf0]  ;;  %v667_v1 = vld [vmem:[#allocation4 + $0x28] sm:$0xf0]  ;;  %v891_v2 = vld [vmem:[#allocation4 + $0xa4] sm:$0xf]  ;;  %v666_v4 = vor.u32 %v876_v60, %v665_v59 }
  0x2e   :  { %350 = vmatpush.bf16.msra.mxu1 %v746_v45  ;;  %v731_v3 = vld [vmem:[#allocation4 + $0xa8] sm:$0xf0]  ;;  %v657_v5 = vld [vmem:[#allocation4 + $0x10] sm:$0xf]  ;;  %v730_v6 = vor.u32 %v892_v63, %v729_v61  ;;  %v670_v7 = vor.u32 %v875_v0, %v667_v1  ;;  %v874_v8 = vld [vmem:[#allocation4 + $0x14] sm:$0xf0] }
  0x2f   :  { %363 = vmatpush.bf16.msra.mxu2 %v686_v46  ;;  %v721_v9 = vld [vmem:[#allocation4 + $0x90] sm:$0xf]  ;;  %v890_v10 = vld [vmem:[#allocation4 + $0x94] sm:$0xf0]  ;;  %v734_v11 = vor.u32 %v891_v2, %v731_v3  ;;  %v873_v12 = vld [vmem:[#allocation4 + $0x14] sm:$0xf]  ;;  %v658_v17 = vor.u32 %v874_v8, %v657_v5 }
  0x30   :  { %376 = vmatpush.bf16.msra.mxu3 %v750_v50  ;;  %v659_v13 = vld [vmem:[#allocation4 + $0x18] sm:$0xf0]  ;;  %v889_v15 = vld [vmem:[#allocation4 + $0x94] sm:$0xf]  ;;  %v649_v18 = vld [vmem:[#allocation4] sm:$0xf]  ;;  %v722_v20 = vor.u32 %v890_v10, %v721_v9 }
  0x31   :  { %338 = vmatpush.bf16.msra.mxu0 %v674_v56  ;;  %v127_v14 = vld [vmem:[#allocation2] sm:$0xff]  ;;  %v872_v19 = vld [vmem:[#allocation4 + $0x4] sm:$0xf0]  ;;  %v662_v21 = vor.u32 %v873_v12, %v659_v13  ;;  %v713_v22 = vld [vmem:[#allocation4 + $0x80] sm:$0xf] }
  0x32   :  { %351 = vmatpush.bf16.msra.mxu1 %v738_v57  ;;  %v723_v16 = vld [vmem:[#allocation4 + $0x98] sm:$0xf0]  ;;  %162 = vst [vmem:[#allocation1] ss:$2 sm:$0xff] %v127_v14  ;;  %v888_v23 = vld [vmem:[#allocation4 + $0x84] sm:$0xf0]  ;;  %v650_v29 = vor.u32 %v872_v19, %v649_v18 }
  0x33   :  { %364 = vmatpush.bf16.msra.mxu2 %v678_v58  ;;  %v871_v24 = vld [vmem:[#allocation4 + $0x4] sm:$0xf]  ;;  %v726_v25 = vor.u32 %v889_v15, %v723_v16  ;;  %v651_v26 = vld [vmem:[#allocation4 + $0x8] sm:$0xf0]  ;;  %v714_v30 = vor.u32 %v888_v23, %v713_v22  ;;  %v910_v32 = vld [vmem:[#allocation7 + $0x38] sm:$0xff] }
  0x34   :  { %377 = vmatpush.bf16.msra.mxu3 %v742_v62  ;;  %v887_v27 = vld [vmem:[#allocation4 + $0x84] sm:$0xf]  ;;  %v715_v28 = vld [vmem:[#allocation4 + $0x88] sm:$0xf0]  ;;  %v654_v31 = vor.u32 %v871_v24, %v651_v26  ;;  %v918_v37 = vld [vmem:[#allocation7 + $0x78] sm:$0xff] }
  0x35   :  { %339 = vmatpush.bf16.msra.mxu0 %v666_v4  ;;  %v718_v33 = vor.u32 %v887_v27, %v715_v28  ;;  %v909_v39 = vld [vmem:[#allocation7 + $0x30] sm:$0xff]  ;;  %v908_v41 = vld [vmem:[#allocation7 + $0x28] sm:$0xff]  ;;  %v907_v43 = vld [vmem:[#allocation7 + $0x20] sm:$0xff] }
  0x36   :  { %352 = vmatpush.bf16.msra.mxu1 %v730_v6  ;;  %v917_v40 = vld [vmem:[#allocation7 + $0x70] sm:$0xff]  ;;  %v916_v42 = vld [vmem:[#allocation7 + $0x68] sm:$0xff]  ;;  %v915_v44 = vld [vmem:[#allocation7 + $0x60] sm:$0xff] }
  0x37   :  { %365 = vmatpush.bf16.msra.mxu2 %v670_v7  ;;  %v906_v45 = vld [vmem:[#allocation7 + $0x18] sm:$0xff]  ;;  %v905_v46 = vld [vmem:[#allocation7 + $0x10] sm:$0xff]  ;;  %v904_v48 = vld [vmem:[#allocation7 + $0x8] sm:$0xff] }
  0x38   :  { %378 = vmatpush.bf16.msra.mxu3 %v734_v11  ;;  %v914_v47 = vld [vmem:[#allocation7 + $0x58] sm:$0xff]  ;;  %v913_v49 = vld [vmem:[#allocation7 + $0x50] sm:$0xff]  ;;  %v903_v50 = vld [vmem:[#allocation7] sm:$0xff] }
  0x39   :  { %340 = vmatpush.bf16.msra.mxu0 %v658_v17  ;;  %v163_v34 = vld.sshfl [vmem:[#allocation1] sm:$0xff pattern:$0x75316420]  ;;  %v164_v35 = vld.sshfl [vmem:[#allocation1 + $0x8] sm:$0xff pattern:$0x75316420] }
  0x3a   :  { %353 = vmatpush.bf16.msra.mxu1 %v722_v20  ;;  %v167_v36 = vpack.c.bf16 %v163_v34, %v163_v34  ;;  %v168_v38 = vpack.c.bf16 %v164_v35, %v164_v35  ;;  %v912_v51 = vld [vmem:[#allocation7 + $0x48] sm:$0xff]  ;;  %v911_v52 = vld [vmem:[#allocation7 + $0x40] sm:$0xff]  ;;  %v925_v54 = vld [vmem:[#allocation10 + $0x30] sm:$0xff] }
  0x3b   :  { %366 = vmatpush.bf16.msra.mxu2 %v662_v21  ;;  %v926_v53 = vld [vmem:[#allocation10 + $0x38] sm:$0xff]  ;;  %v924_v55 = vld [vmem:[#allocation10 + $0x28] sm:$0xff]  ;;  %v923_v57 = vld [vmem:[#allocation10 + $0x20] sm:$0xff] }
  0x3c   :  { %379 = vmatpush.bf16.msra.mxu3 %v726_v25  ;;  %v160_v56 = vld [vmem:[#allocation6] sm:$0x3]  ;;  %v921_v15 = vld [vmem:[#allocation10 + $0x10] sm:$0xff]  ;;  %v920_v16 = vld [vmem:[#allocation10 + $0x8] sm:$0xff] }
  0x3d   :  { %341 = vmatpush.bf16.msra.mxu0 %v650_v29  ;;  %v170_v58 = vperm.slane %v160_v56, 0  ;;  %v922_v59 = vld [vmem:[#allocation10 + $0x18] sm:$0xff]  ;;  %v171_v0 = vperm.slane %v160_v56, 1  ;;  %v919_v17 = vld [vmem:[#allocation10] sm:$0xff] }
  0x3e   :  { %354 = vmatpush.bf16.msra.mxu1 %v714_v30  ;;  %v938_v19 = vld [vmem:[#allocation9] ss:$0 sm:$0xff]  ;;  %v939_v28 = vld [vmem:[#allocation12] ss:$0 sm:$0xff] }
  0x3f   :  { %367 = vmatpush.bf16.msra.mxu2 %v654_v31 }
  0x40   :  { %380 = vmatpush.bf16.msra.mxu3 %v718_v33  ;;  %342 = vmatmul.bf16.vlgmr.msra.gmra.mxu0 %v167_v36 }
  0x41   :  { %526 = vmatpush.bf16.msrb.mxu0 %v910_v32  ;;  %355 = vmatmul.bf16.vlgmr.msra.gmra.mxu1 %v168_v38 }
  0x42   :  { %539 = vmatpush.bf16.msrb.mxu1 %v918_v37  ;;  %368 = vmatmul.bf16.vlgmr.msra.gmra.mxu2 %v167_v36 }
  0x43   :  { %381 = vmatmul.bf16.vlgmr.msra.gmra.mxu3 %v168_v38  ;;  %624 = vmatpush.bf16.msrb.mxu2 %v926_v53 }
  0x45   :  { %527 = vmatpush.bf16.msrb.mxu0 %v909_v39 }
  0x46   :  { %540 = vmatpush.bf16.msrb.mxu1 %v917_v40 }
  0x47   :  { %625 = vmatpush.bf16.msrb.mxu2 %v925_v54 }
  0x49   :  { %528 = vmatpush.bf16.msrb.mxu0 %v908_v41 }
  0x4a   :  { %541 = vmatpush.bf16.msrb.mxu1 %v916_v42 }
  0x4b   :  { %626 = vmatpush.bf16.msrb.mxu2 %v924_v55 }
  0x4d   :  { %529 = vmatpush.bf16.msrb.mxu0 %v907_v43 }
  0x4e   :  { %542 = vmatpush.bf16.msrb.mxu1 %v915_v44 }
  0x4f   :  { %627 = vmatpush.bf16.msrb.mxu2 %v923_v57 }
  0x51   :  { %530 = vmatpush.bf16.msrb.mxu0 %v906_v45 }
  0x52   :  { %543 = vmatpush.bf16.msrb.mxu1 %v914_v47 }
  0x53   :  { %628 = vmatpush.bf16.msrb.mxu2 %v922_v59 }
  0x55   :  { %531 = vmatpush.bf16.msrb.mxu0 %v905_v46 }
  0x56   :  { %544 = vmatpush.bf16.msrb.mxu1 %v913_v49 }
  0x57   :  { %629 = vmatpush.bf16.msrb.mxu2 %v921_v15 }
  0x59   :  { %532 = vmatpush.bf16.msrb.mxu0 %v904_v48 }
  0x5a   :  { %545 = vmatpush.bf16.msrb.mxu1 %v912_v51 }
  0x5b   :  { %630 = vmatpush.bf16.msrb.mxu2 %v920_v16 }
  0x5d   :  { %533 = vmatpush.bf16.msrb.mxu0 %v903_v50 }
  0x5e   :  { %546 = vmatpush.bf16.msrb.mxu1 %v911_v52 }
  0x5f   :  { %631 = vmatpush.bf16.msrb.mxu2 %v919_v17 }
  0xbd   :  { %v343_v60 = vpop.f32.mrf.mxu0 }
  0xbe   :  { %v344_v61 = vadd.f32 %v343_v60, %v170_v58  ;;  %v356_v62 = vpop.f32.mrf.mxu1 }
  0xc0   :  { %v357_v63 = vadd.f32 %v356_v62, %v344_v61 }
  0xc2   :  { %vm386_vm0 = vcmp.gt.f32.partialorder %v357_v63, 0.0  ;;  %v388_v1 = vmul.f32 0.2, %v357_v63 }
  0xc4   :  { %v390_v3 = vsel %vm386_vm0, %v357_v63, %v388_v1 }
  0xc5   :  { %v369_v2 = vpop.f32.mrf.mxu2  ;;  %v345_v6 = vpop.f32.mrf.mxu0  ;;  %v425_v7 = vpack.c.bf16 %v390_v3, %v390_v3 }
  0xc6   :  { %v370_v4 = vadd.f32 %v369_v2, %v171_v0  ;;  %v382_v5 = vpop.f32.mrf.mxu3  ;;  %v358_v8 = vpop.f32.mrf.mxu1 }
  0xc7   :  { %534 = vmatmul.bf16.vlgmr.msrb.gmra.mxu0 %v425_v7 }
  0xc8   :  { %v383_v9 = vadd.f32 %v382_v5, %v370_v4 }
  0xca   :  { %vm387_vm1 = vcmp.gt.f32.partialorder %v383_v9, 0.0  ;;  %v389_v10 = vmul.f32 0.2, %v383_v9 }
  0xcc   :  { %v391_v11 = vsel %vm387_vm1, %v383_v9, %v389_v10 }
  0xcd   :  { %v371_v12 = vpop.f32.mrf.mxu2  ;;  %v426_v13 = vpack.c.bf16 %v391_v11, %v391_v11 }
  0xce   :  { %v384_v14 = vpop.f32.mrf.mxu3 }
  0xcf   :  { %547 = vmatmul.bf16.vlgmr.msrb.gmra.mxu1 %v426_v13 }
 0x144   :  { %v535_v18 = vpop.f32.mrf.mxu0 }
 0x145   :  { %v536_v20 = vadd.f32 %v938_v19, %v535_v18 }
 0x14c   :  { %v548_v21 = vpop.f32.mrf.mxu1  ;;  %v537_v23 = vpop.f32.mrf.mxu0 }
 0x14d   :  { %v549_v22 = vadd.f32 %v548_v21, %v536_v20 }
 0x14f   :  { %vm552_vm2 = vcmp.gt.f32.partialorder %v549_v22, 0.0  ;;  %v553_v24 = vmul.f32 0.2, %v549_v22 }
 0x151   :  { %v554_v25 = vsel %vm552_vm2, %v549_v22, %v553_v24 }
 0x152   :  { %v572_v26 = vpack.c.bf16 %v554_v25, %v554_v25 }
 0x154   :  { %v550_v27 = vpop.f32.mrf.mxu1  ;;  %632 = vmatmul.bf16.vlgmr.msrb.gmra.mxu2 %v572_v26 }
 0x1d7   :  { %v633_v29 = vpop.f32.mrf.mxu2 }
 0x1d8   :  { %v634_v30 = vadd.f32 %v939_v28, %v633_v29 }
 0x1da   :  { %v637_v31 = vmax.f32 %v634_v30, 0.0 }
 0x1dc   :  { %638 = vst [vmem:[%s1198_s7] sm:$0xf] %v637_v31 }
 0x1df   :  { %v635_v32 = vpop.f32.mrf.mxu2 }
 0x1e0   :  { %643 = vsyncpa [#allocation3], 1 }
 0x1e1   :  { %644 = vsyncpa [#allocation5], 1 }
 0x1e2   :  { %645 = vsyncpa [#allocation8], 1 }
 0x1e3   :  { %646 = vsyncpa [#allocation11], 1 }

// kernel: gen_forward.7
= control target key start
LH: loop header
LB: loop body
LE: loop exit
PB: predicated region body
PF: predicated region fallthrough
CT: control target
= control target key end

     0   :  { %10 = vsyncpa [#allocation3], 0  ;;  %s387_s0 = inlined_call_operand.vmem [shape: f32[16,64], index: 0, kind: input, shape index: {}]   ;;  %s388_s1 = inlined_call_operand.hbm [shape: bf16[64,64], index: 1, kind: input, shape index: {}]   ;;  %s389_s2 = inlined_call_operand.hbm [shape: f32[1,64], index: 2, kind: input, shape index: {}]   ;;  %s390_s3 = inlined_call_operand.vmem [shape: bf16[64,16], index: 3, kind: input, shape index: {}]   ;;  %s391_s4 = inlined_call_operand.hbm [shape: f32[1,16], index: 4, kind: input, shape index: {}]   ;;  %s392_s5 = inlined_call_operand.vmem [shape: f32[16,16], index: 5, kind: output, shape index: {}]  }
   0x1   :  { %11 = vsyncpa [#allocation5], 0  ;;  %s32_s20 = sshll.u32 %s389_s2, 4  ;;  %s317_s21 = smov [#allocation4]   ;;  %s33_s20 = int_to_ptr.hbm [resolvable:$true] %s32_s20 }
   0x2   :  { %s34_s22 = sshll.u32 %s317_s21, 4  ;;  %s18_s25 = sshll.u32 %s388_s1, 4  ;;  %s35_s22 = int_to_ptr.vmem [resolvable:$true] %s34_s22  ;;  %s19_s25 = int_to_ptr.hbm [resolvable:$true] %s18_s25 }
   0x3   :  { %37 = dma.hbm_to_vmem [thread:$0]  %s33_s20, 16, %s35_s22, [#allocation5]  }
   0x4   :  { %s318_s26 = smov [#allocation2]   ;;  %s319_s28 = smov 64  }
   0x5   :  { %s20_s27 = sshll.u32 %s318_s26, 4  ;;  %s320_s29 = smov 4   ;;  %s21_s27 = int_to_ptr.vmem [resolvable:$true] %s20_s27 }
   0x6   :  { %26 = dma.hbm_to_vmem [thread:$0]  %s19_s25, 512, %s21_s27, [#allocation3], %s319_s28, %s319_s28, %s320_s29  }
   0x7   :  { %s45_s2 = sshll.u32 %s391_s4, 4  ;;  %s321_s7 = smov [#allocation6]   ;;  %s46_s2 = int_to_ptr.hbm [resolvable:$true] %s45_s2 }
   0x8   :  { %s47_s8 = sshll.u32 %s321_s7, 4  ;;  %s48_s8 = int_to_ptr.vmem [resolvable:$true] %s47_s8 }
   0x9   :  { %50 = dma.hbm_to_vmem [thread:$0]  %s46_s2, 16, %s48_s8, [#allocation5]  }
   0xa   :  { %313 = dma.done.wait [#allocation3], 512  }
   0xb   :  { %314 = vsyncadd [#allocation3], 4294966784 }
   0xc   :  { %315 = dma.done.wait [#allocation5], 32  }
   0xd   :  { %316 = vsyncadd [#allocation5], 4294967264  ;;  %v229_v0 = vld [vmem:[#allocation2 + $0x18] sm:$0xff]  ;;  %v228_v1 = vld [vmem:[#allocation2 + $0x10] sm:$0xff]  ;;  %vm103_vm0 = vcmask 523264   ;;  %vm183_vm3 = vcmask 130048  }
   0xe   :  { %111 = vmatpush.bf16.msra.mxu0 %v229_v0  ;;  %v227_v2 = vld [vmem:[#allocation2 + $0x8] sm:$0xff]  ;;  %v226_v3 = vld [vmem:[#allocation2] sm:$0xff]  ;;  %v233_v7 = vld [vmem:[%s390_s3 + $0x18] sm:$0xff] }
   0xf   :  { %v64_v4 = vld [vmem:[%s387_s0] sm:$0xff]  ;;  %v65_v5 = vld [vmem:[%s387_s0 + $0x8] sm:$0xff]  ;;  %171 = vmatpush.bf16.msra.mxu1 %v233_v7  ;;  %v232_v8 = vld [vmem:[%s390_s3 + $0x10] sm:$0xff] }
  0x10   :  { %v75_v6 = vpack.c.bf16 %v65_v5, %v64_v4  ;;  %v231_v9 = vld [vmem:[%s390_s3 + $0x8] sm:$0xff]  ;;  %v230_v10 = vld [vmem:[%s390_s3] sm:$0xff] }
  0x11   :  { %v239_v12 = vld [vmem:[#allocation4] ss:$0 sm:$0xff]  ;;  %v240_v21 = vld [vmem:[#allocation6] ss:$0 sm:$0xff] }
  0x12   :  { %112 = vmatpush.bf16.msra.mxu0 %v228_v1 }
  0x13   :  { %172 = vmatpush.bf16.msra.mxu1 %v232_v8 }
  0x16   :  { %113 = vmatpush.bf16.msra.mxu0 %v227_v2 }
  0x17   :  { %173 = vmatpush.bf16.msra.mxu1 %v231_v9 }
  0x1a   :  { %114 = vmatpush.bf16.msra.mxu0 %v226_v3 }
  0x1b   :  { %174 = vmatpush.bf16.msra.mxu1 %v230_v10 }
  0x1d   :  { %208 = vmatmul.msk.bf16.vlgmr.msra.gmra.mxu0 %vm103_vm0, %v75_v6 }
  0x9a   :  { %v116_v11 = vpop.f32.mrf.mxu0 }
  0x9b   :  { %v117_v13 = vadd.f32 %v239_v12, %v116_v11 }
  0x9d   :  { %v123_v15 = vmul.f32 0.2, %v117_v13  ;;  %vm121_vm1 = vcmp.gt.f32.partialorder %v117_v13, 0.0 }
  0x9f   :  { %v125_v18 = vsel %vm121_vm1, %v117_v13, %v123_v15 }
  0xa2   :  { %v118_v14 = vpop.f32.mrf.mxu0 }
  0xa3   :  { %v119_v16 = vadd.f32 %v239_v12, %v118_v14 }
  0xa5   :  { %vm122_vm2 = vcmp.gt.f32.partialorder %v119_v16, 0.0  ;;  %v124_v17 = vmul.f32 0.2, %v119_v16 }
  0xa7   :  { %v126_v19 = vsel %vm122_vm2, %v119_v16, %v124_v17 }
  0xa8   :  { %v136_v20 = vpack.c.bf16 %v126_v19, %v125_v18 }
  0xaa   :  { %225 = vmatmul.msk.bf16.vlgmr.msra.gmra.mxu1 %vm103_vm0, %v136_v20 }
 0x127   :  { %v176_v22 = vpop.f32.mrf.mxu1 }
 0x128   :  { %v177_v23 = vadd.f32 %v240_v21, %v176_v22 }
 0x12a   :  { %v181_v24 = vmax.f32 %v177_v23, 0.0 }
 0x12c   :  { %184 = vst.msk [vmem:[%s392_s5] sm:$0xff] %vm183_vm3, %v181_v24 }
 0x12f   :  { %v178_v25 = vpop.f32.mrf.mxu1 }
 0x130   :  { %v179_v26 = vadd.f32 %v240_v21, %v178_v25 }
 0x132   :  { %v182_v27 = vmax.f32 %v179_v26, 0.0 }
 0x134   :  { %185 = vst.msk [vmem:[%s392_s5 + $0x8] sm:$0xff] %vm183_vm3, %v182_v27 }
 0x135   :  { %190 = vsyncpa [#allocation3], 1 }
 0x136   :  { %191 = vsyncpa [#allocation5], 1 }

</bundles_post_ra>
